<compile_context>
chip_gen: v5e
topology: v5e:2x2
jax: 0.10.0
libtpu: 0.0.40
codegen_flags: <defaults>
</compile_context>

<pallas_src>
import functools

import jax
import jax.numpy as jnp
from jax.experimental import pallas as pl
from jax.experimental.pallas import tpu as pltpu


def _pick_batches_per_block(B, cg, slab_bytes, target_bytes=2 << 20):
    """Batch elements packed per grid step: largest legal block <= ~2 MiB
    (double-buffered in+out stays well under v7x's 64 MiB VMEM) that still
    leaves >= 2 grid steps (pipelining + v7x megacore) and keeps the block's
    sublane count Mosaic-legal (multiple of 8, or the full array dim)."""
    legal = [bt for bt in range(1, B + 1)
             if B % bt == 0 and ((bt * cg) % 8 == 0 or bt == B)]
    for need_multi_step in (True, False):
        cand = [bt for bt in legal
                if bt * slab_bytes <= target_bytes
                and (B // bt >= 2 or not need_multi_step)]
        if cand:
            return max(cand)
    return min(legal)


def _se_kernel(x_ref, pool_ref, exp_ref, sel_ref, selt_ref, w1r_ref, w2r_ref,
               o_ref, *, g, hw):
    # x_ref: (R, L) with R = Bt * C//g rows and L = g*HW lanes.
    x = x_ref[...]                                       # native dtype

    # ---- Squeeze: spatial mean per (row, lane-group) == per (batch, channel).
    if g == 1:
        pooled = jnp.mean(x.astype(jnp.float32), axis=-1, keepdims=True)      # (R, 1)
    else:
        pooled = jnp.dot(x, pool_ref[...],
                         preferred_element_type=jnp.float32) * (1.0 / hw)      # (R, g)

    # ---- Excitation: fc1 -> ReLU -> fc2 -> sigmoid, batched over the Bt batch
    # elements of this block.  w1r[j] holds, for every block row, the fc1
    # column of the channel stored in that row's lane-group j, so per-channel
    # contributions reduce over rows with the 0/1 `sel` matmul (no reshapes).
    t = pooled[:, 0:1] * w1r_ref[0]                                            # (R, Cr)
    for j in range(1, g):                                                      # g is tiny & static
        t = t + pooled[:, j:j + 1] * w1r_ref[j]
    h = jnp.maximum(
        jnp.dot(sel_ref[...], t, preferred_element_type=jnp.float32), 0.0)     # (Bt, Cr)

    # Replicate h back to rows (0/1 selT matmul) and apply fc2 per lane-group
    # via the matching per-row fc2 table, then the sigmoid gate.
    h_rows = jnp.dot(selt_ref[...], h, preferred_element_type=jnp.float32)     # (R, Cr)
    cols = [
        jax.nn.sigmoid(jnp.sum(h_rows * w2r_ref[j], axis=-1, keepdims=True))   # (R, 1)
        for j in range(g)
    ]
    s_col = cols[0] if g == 1 else jnp.concatenate(cols, axis=-1)              # (R, g)

    # ---- Scale: broadcast each channel gate over its HW lane segment and
    # rescale x in its native dtype (no f32 promotion of the big slab).
    if g == 1:
        gate = s_col.astype(x.dtype)                                           # (R, 1) bcast
    else:
        gate = jnp.dot(s_col.astype(x.dtype), exp_ref[...],
                       preferred_element_type=jnp.float32).astype(x.dtype)     # (R, L)
    o_ref[...] = (x * gate).astype(o_ref.dtype)


def se_block(x: jax.Array, w1: jax.Array, w2: jax.Array) -> jax.Array:
    """SE forward.  x: (B, C, H, W) NCHW; w1: (C//r, C); w2: (C, C//r)."""
    B, C, H, W = x.shape
    Cr = w1.shape[0]
    assert w1.shape == (Cr, C) and w2.shape == (C, Cr)
    HW = H * W
    itemsize = x.dtype.itemsize

    # Lane-dense channel grouping: fold g adjacent channels into the lane axis
    # so the block's last dim hits a multiple of 128.  Pure row-major reshape,
    # so it costs no HBM traffic.
    if HW % 128 == 0:
        g = 1
    elif HW < 128 and 128 % HW == 0 and (128 // HW) <= 8 and C % (128 // HW) == 0:
        g = 128 // HW
    else:
        g = 1  # TODO(synk): lcm-based grouping for e.g. 7x7 maps with large C.
    Cg = C // g
    L = g * HW

    x2 = x.reshape(B * Cg, L)

    slab_bytes = Cg * L * itemsize
    Bt = _pick_batches_per_block(B, Cg, slab_bytes)
    R = Bt * Cg
    grid = (B // Bt,)
    block_bytes = R * L * itemsize

    # ---- Hoisted, per-shape constants (built once in the wrapper) ----------
    f32 = jnp.float32
    w1_t = w1.T.astype(f32)                                   # (C, Cr)
    w2_t = w2.T.astype(f32)                                   # (Cr, C)
    chan0 = (jnp.arange(R) % Cg) * g                          # base channel per block row
    w1r = jnp.stack([w1_t[chan0 + j, :] for j in range(g)], axis=0)    # (g, R, Cr)
    w2r = jnp.stack([w2_t[:, chan0 + j].T for j in range(g)], axis=0)  # (g, R, Cr)
    sel = jnp.repeat(jnp.eye(Bt, dtype=f32), Cg, axis=1)      # (Bt, R) 0/1 batch-sum
    selt = sel.T                                              # (R, Bt) row replication
    eye_g = jnp.eye(g, dtype=x.dtype)
    pool01 = jnp.repeat(eye_g, HW, axis=0)                    # (L, g) segment sums
    expand01 = jnp.repeat(eye_g, HW, axis=1)                  # (g, L) segment broadcast

    kernel = functools.partial(_se_kernel, g=g, hw=HW)

    cost = pl.CostEstimate(
        flops=int(5 * B * C * HW + 4 * B * C * Cr),
        transcendentals=int(B * C),
        bytes_accessed=int(2 * B * C * HW * itemsize + 4 * (w1.size + w2.size)),
    )

    out2 = pl.pallas_call(
        kernel,
        out_shape=jax.ShapeDtypeStruct((B * Cg, L), x.dtype),
        grid_spec=pltpu.PrefetchScalarGridSpec(
            num_scalar_prefetch=0,
            grid=grid,
            in_specs=[
                pl.BlockSpec((R, L), lambda b: (b, 0)),            # x slab (lane-dense)
                pl.BlockSpec((L, g), lambda b: (0, 0)),            # pool01   (resident)
                pl.BlockSpec((g, L), lambda b: (0, 0)),            # expand01 (resident)
                pl.BlockSpec((Bt, R), lambda b: (0, 0)),           # sel      (resident)
                pl.BlockSpec((R, Bt), lambda b: (0, 0)),           # selT     (resident)
                pl.BlockSpec((g, R, Cr), lambda b: (0, 0, 0)),     # w1r      (resident)
                pl.BlockSpec((g, R, Cr), lambda b: (0, 0, 0)),     # w2r      (resident)
            ],
            out_specs=pl.BlockSpec((R, L), lambda b: (b, 0)),
        ),
        compiler_params=pltpu.CompilerParams(
            dimension_semantics=("parallel",),
            vmem_limit_bytes=int(min(64 << 20, 4 * block_bytes + (16 << 20))),
        ),
        cost_estimate=cost,
    )(x2, pool01, expand01, sel, selt, w1r, w2r)

    return out2.reshape(B, C, H, W)


def _reference(x, w1, w2):
    # Pure-JAX reference mirroring the PyTorch forward.
    pooled = jnp.mean(x, axis=(2, 3))                 # (B, C)
    h = jnp.maximum(pooled @ w1.T, 0.0)               # (B, C//r)
    s = jax.nn.sigmoid(h @ w2.T)                      # (B, C)
    return x * s[:, :, None, None]


if __name__ == "__main__":
    key = jax.random.PRNGKey(0)
    k_x, k_w1, k_w2 = jax.random.split(key, 3)

    B, C, H, W = 8, 64, 8, 8          # in_channels=64, reduction=16 -> hidden=4
    reduction = 16
    Cr = C // reduction

    x = jax.random.normal(k_x, (B, C, H, W), dtype=jnp.float32)
    # nn.Linear layout: (out_features, in_features), bias-free.
    w1 = jax.random.normal(k_w1, (Cr, C), dtype=jnp.float32) * 0.1
    w2 = jax.random.normal(k_w2, (C, Cr), dtype=jnp.float32) * 0.1

    se = jax.jit(se_block)
    out = jax.block_until_ready(se(x, w1, w2))

    ref = _reference(x, w1, w2)
    assert out.shape == (B, C, H, W)
    assert jnp.allclose(out, ref, atol=2e-5, rtol=2e-5), "mismatch vs reference"

    print("KERNEL_OK")
</pallas_src>

<mosaic_0001>
module attributes {stable_mosaic.version = 11 : i64} {
  func.func @_se_kernel(%arg0: i32, %arg1: memref<128x128xf32, #tpu.memory_space<vmem>>, %arg2: memref<128x2xf32, #tpu.memory_space<vmem>>, %arg3: memref<2x128xf32, #tpu.memory_space<vmem>>, %arg4: memref<4x128xf32, #tpu.memory_space<vmem>>, %arg5: memref<128x4xf32, #tpu.memory_space<vmem>>, %arg6: memref<2x128x4xf32, #tpu.memory_space<vmem>>, %arg7: memref<2x128x4xf32, #tpu.memory_space<vmem>>, %arg8: memref<128x128xf32, #tpu.memory_space<vmem>>) attributes {dimension_semantics = [#tpu.dimension_semantics<parallel>], iteration_bounds = array<i64: 2>, scalar_prefetch = 0 : i64, scratch_operands = 0 : i64, tpu.core_type = #tpu.core_type<tc>, window_params = [{transform_indices = @transform_0, window_bounds = array<i64: 128, 128>}, {pipeline_mode = #tpu.pipeline_mode<synchronous>, transform_indices = @transform_1, window_bounds = array<i64: 128, 2>}, {pipeline_mode = #tpu.pipeline_mode<synchronous>, transform_indices = @transform_2, window_bounds = array<i64: 2, 128>}, {pipeline_mode = #tpu.pipeline_mode<synchronous>, transform_indices = @transform_3, window_bounds = array<i64: 4, 128>}, {pipeline_mode = #tpu.pipeline_mode<synchronous>, transform_indices = @transform_4, window_bounds = array<i64: 128, 4>}, {pipeline_mode = #tpu.pipeline_mode<synchronous>, transform_indices = @transform_5, window_bounds = array<i64: 2, 128, 4>}, {pipeline_mode = #tpu.pipeline_mode<synchronous>, transform_indices = @transform_6, window_bounds = array<i64: 2, 128, 4>}, {transform_indices = @transform_7, window_bounds = array<i64: 128, 128>}]} {
    %c0 = arith.constant 0 : index
    %c0_0 = arith.constant 0 : index
    %0 = vector.load %arg1[%c0, %c0_0] : memref<128x128xf32, #tpu.memory_space<vmem>>, vector<128x128xf32>
    %c0_1 = arith.constant 0 : index
    %c0_2 = arith.constant 0 : index
    %1 = vector.load %arg2[%c0_1, %c0_2] : memref<128x2xf32, #tpu.memory_space<vmem>>, vector<128x2xf32>
    %cst = arith.constant dense<0.000000e+00> : vector<128x2xf32>
    %2 = tpu.matmul %0, %1, %cst {dimension_numbers = #tpu.dot_dimension_numbers<[1], [0], [0], [1], [0, 0, 1, 1], [], []>} : vector<128x128xf32>, vector<128x2xf32>, vector<128x2xf32> -> vector<128x2xf32>
    %cst_3 = arith.constant 1.562500e-02 : f32
    %3 = vector.broadcast %cst_3 : f32 to vector<128x2xf32>
    %4 = arith.mulf %2, %3 : vector<128x2xf32>
    %5 = vector.extract_strided_slice %4 {offsets = [0, 0], sizes = [128, 1], strides = [1, 1]} : vector<128x2xf32> to vector<128x1xf32>
    %c0_4 = arith.constant 0 : index
    %c0_5 = arith.constant 0 : index
    %c0_6 = arith.constant 0 : index
    %6 = vector.load %arg6[%c0_4, %c0_5, %c0_6] : memref<2x128x4xf32, #tpu.memory_space<vmem>>, vector<1x128x4xf32>
    %7 = vector.shape_cast %6 : vector<1x128x4xf32> to vector<128x4xf32>
    %8 = vector.broadcast %5 : vector<128x1xf32> to vector<128x4xf32>
    %9 = arith.mulf %8, %7 : vector<128x4xf32>
    %10 = vector.extract_strided_slice %4 {offsets = [0, 1], sizes = [128, 1], strides = [1, 1]} : vector<128x2xf32> to vector<128x1xf32>
    %c1 = arith.constant 1 : index
    %c0_7 = arith.constant 0 : index
    %c0_8 = arith.constant 0 : index
    %11 = vector.load %arg6[%c1, %c0_7, %c0_8] : memref<2x128x4xf32, #tpu.memory_space<vmem>>, vector<1x128x4xf32>
    %12 = vector.shape_cast %11 : vector<1x128x4xf32> to vector<128x4xf32>
    %13 = vector.broadcast %10 : vector<128x1xf32> to vector<128x4xf32>
    %14 = arith.mulf %13, %12 : vector<128x4xf32>
    %15 = arith.addf %9, %14 : vector<128x4xf32>
    %c0_9 = arith.constant 0 : index
    %c0_10 = arith.constant 0 : index
    %16 = vector.load %arg4[%c0_9, %c0_10] : memref<4x128xf32, #tpu.memory_space<vmem>>, vector<4x128xf32>
    %cst_11 = arith.constant dense<0.000000e+00> : vector<4x4xf32>
    %17 = tpu.matmul %16, %15, %cst_11 {dimension_numbers = #tpu.dot_dimension_numbers<[1], [0], [0], [1], [0, 0, 1, 1], [], []>} : vector<4x128xf32>, vector<128x4xf32>, vector<4x4xf32> -> vector<4x4xf32>
    %cst_12 = arith.constant 0.000000e+00 : f32
    %18 = vector.broadcast %cst_12 : f32 to vector<4x4xf32>
    %19 = arith.maximumf %17, %18 : vector<4x4xf32>
    %c0_13 = arith.constant 0 : index
    %c0_14 = arith.constant 0 : index
    %20 = vector.load %arg5[%c0_13, %c0_14] : memref<128x4xf32, #tpu.memory_space<vmem>>, vector<128x4xf32>
    %cst_15 = arith.constant dense<0.000000e+00> : vector<128x4xf32>
    %21 = tpu.matmul %20, %19, %cst_15 {dimension_numbers = #tpu.dot_dimension_numbers<[1], [0], [0], [1], [0, 0, 1, 1], [], []>} : vector<128x4xf32>, vector<4x4xf32>, vector<128x4xf32> -> vector<128x4xf32>
    %c0_16 = arith.constant 0 : index
    %c0_17 = arith.constant 0 : index
    %c0_18 = arith.constant 0 : index
    %22 = vector.load %arg7[%c0_16, %c0_17, %c0_18] : memref<2x128x4xf32, #tpu.memory_space<vmem>>, vector<1x128x4xf32>
    %23 = vector.shape_cast %22 : vector<1x128x4xf32> to vector<128x4xf32>
    %24 = arith.mulf %21, %23 : vector<128x4xf32>
    %cst_19 = arith.constant dense<0.000000e+00> : vector<128xf32>
    %25 = vector.multi_reduction <add>, %24, %cst_19 [1] : vector<128x4xf32> to vector<128xf32>
    %26 = vector.shape_cast %25 : vector<128xf32> to vector<128x1xf32>
    %27 = arith.negf %26 : vector<128x1xf32>
    %28 = math.exp %27 : vector<128x1xf32>
    %cst_20 = arith.constant 1.000000e+00 : f32
    %29 = vector.broadcast %cst_20 : f32 to vector<128x1xf32>
    %30 = arith.addf %29, %28 : vector<128x1xf32>
    %31 = arith.divf %29, %30 : vector<128x1xf32>
    %c1_21 = arith.constant 1 : index
    %c0_22 = arith.constant 0 : index
    %c0_23 = arith.constant 0 : index
    %32 = vector.load %arg7[%c1_21, %c0_22, %c0_23] : memref<2x128x4xf32, #tpu.memory_space<vmem>>, vector<1x128x4xf32>
    %33 = vector.shape_cast %32 : vector<1x128x4xf32> to vector<128x4xf32>
    %34 = arith.mulf %21, %33 : vector<128x4xf32>
    %cst_24 = arith.constant dense<0.000000e+00> : vector<128xf32>
    %35 = vector.multi_reduction <add>, %34, %cst_24 [1] : vector<128x4xf32> to vector<128xf32>
    %36 = vector.shape_cast %35 : vector<128xf32> to vector<128x1xf32>
    %37 = arith.negf %36 : vector<128x1xf32>
    %38 = math.exp %37 : vector<128x1xf32>
    %cst_25 = arith.constant 1.000000e+00 : f32
    %39 = vector.broadcast %cst_25 : f32 to vector<128x1xf32>
    %40 = arith.addf %39, %38 : vector<128x1xf32>
    %41 = arith.divf %39, %40 : vector<128x1xf32>
    %42 = tpu.concatenate %31, %41 in 1 : vector<128x1xf32>, vector<128x1xf32> -> vector<128x2xf32>
    %c0_26 = arith.constant 0 : index
    %c0_27 = arith.constant 0 : index
    %43 = vector.load %arg3[%c0_26, %c0_27] : memref<2x128xf32, #tpu.memory_space<vmem>>, vector<2x128xf32>
    %cst_28 = arith.constant dense<0.000000e+00> : vector<128x128xf32>
    %44 = tpu.matmul %42, %43, %cst_28 {dimension_numbers = #tpu.dot_dimension_numbers<[1], [0], [0], [1], [0, 0, 1, 1], [], []>} : vector<128x2xf32>, vector<2x128xf32>, vector<128x128xf32> -> vector<128x128xf32>
    %45 = arith.mulf %0, %44 : vector<128x128xf32>
    %c0_29 = arith.constant 0 : index
    %c0_30 = arith.constant 0 : index
    %46 = vector.load %arg8[%c0_29, %c0_30] : memref<128x128xf32, #tpu.memory_space<vmem>>, vector<128x128xf32>
    tpu.vector_store %arg8[%c0_29, %c0_30], %45 {strides = array<i32>} : memref<128x128xf32, #tpu.memory_space<vmem>>, vector<128x128xf32>,
    return
  }
  func.func @transform_0(%arg0: i32) -> (i32, i32) {
    %c0_i32 = arith.constant 0 : i32
    %c0_i32_0 = arith.constant 0 : i32
    return %arg0, %c0_i32 : i32, i32
  }
  func.func @transform_1(%arg0: i32) -> (i32, i32) {
    %c0_i32 = arith.constant 0 : i32
    %c0_i32_0 = arith.constant 0 : i32
    %c0_i32_1 = arith.constant 0 : i32
    return %c0_i32, %c0_i32_0 : i32, i32
  }
  func.func @transform_2(%arg0: i32) -> (i32, i32) {
    %c0_i32 = arith.constant 0 : i32
    %c0_i32_0 = arith.constant 0 : i32
    %c0_i32_1 = arith.constant 0 : i32
    return %c0_i32, %c0_i32_0 : i32, i32
  }
  func.func @transform_3(%arg0: i32) -> (i32, i32) {
    %c0_i32 = arith.constant 0 : i32
    %c0_i32_0 = arith.constant 0 : i32
    %c0_i32_1 = arith.constant 0 : i32
    return %c0_i32, %c0_i32_0 : i32, i32
  }
  func.func @transform_4(%arg0: i32) -> (i32, i32) {
    %c0_i32 = arith.constant 0 : i32
    %c0_i32_0 = arith.constant 0 : i32
    %c0_i32_1 = arith.constant 0 : i32
    return %c0_i32, %c0_i32_0 : i32, i32
  }
  func.func @transform_5(%arg0: i32) -> (i32, i32, i32) {
    %c0_i32 = arith.constant 0 : i32
    %c0_i32_0 = arith.constant 0 : i32
    %c0_i32_1 = arith.constant 0 : i32
    %c0_i32_2 = arith.constant 0 : i32
    return %c0_i32, %c0_i32_0, %c0_i32_1 : i32, i32, i32
  }
  func.func @transform_6(%arg0: i32) -> (i32, i32, i32) {
    %c0_i32 = arith.constant 0 : i32
    %c0_i32_0 = arith.constant 0 : i32
    %c0_i32_1 = arith.constant 0 : i32
    %c0_i32_2 = arith.constant 0 : i32
    return %c0_i32, %c0_i32_0, %c0_i32_1 : i32, i32, i32
  }
  func.func @transform_7(%arg0: i32) -> (i32, i32) {
    %c0_i32 = arith.constant 0 : i32
    %c0_i32_0 = arith.constant 0 : i32
    return %arg0, %c0_i32 : i32, i32
  }
}

</mosaic_0001>

<bundles_post_ra>
// kernel: se_block.1
= control target key start
LH: loop header
LB: loop body
LE: loop exit
PB: predicated region body
PF: predicated region fallthrough
CT: control target
= control target key end

     0   :  { %s2123_s24 = smov 0   ;;  %s3137_s0 = inlined_call_operand.vmem [shape: f32[256,128], index: 0, kind: input, shape index: {}]   ;;  %s3138_s1 = inlined_call_operand.vmem [shape: f32[128,2], index: 1, kind: input, shape index: {}]   ;;  %s3139_s2 = inlined_call_operand.vmem [shape: f32[2,128], index: 2, kind: input, shape index: {}]   ;;  %s3140_s3 = inlined_call_operand.vmem [shape: f32[4,128], index: 3, kind: input, shape index: {}]   ;;  %s3141_s4 = inlined_call_operand.vmem [shape: f32[128,4], index: 4, kind: input, shape index: {}]   ;;  %s3142_s5 = inlined_call_operand.vmem [shape: f32[2,128,4], index: 5, kind: input, shape index: {}]   ;;  %s3143_s6 = inlined_call_operand.vmem [shape: f32[2,128,4], index: 6, kind: input, shape index: {}]   ;;  %s3144_s7 = inlined_call_operand.vmem [shape: f32[256,128], index: 7, kind: output, shape index: {}]  }
   0x1 LB: > { %s1769_s25 = sadd.s32 4294967295, %s2079_s24   ;;  %p1773_p0 = scmp.ge.s32.totalorder %s2079_s24, 1  ;;  %s2079_s24 = sphi %s2123_s24, %s17_s24  }
   0x2   : > { %p238_p1 = scmp.lt.s32.totalorder %s2079_s24, 3 }
   0x4   : > { %p239_p2 = pnand %p1773_p0, %p238_p1 }
   0x5   : > { %s1774_s19 = sshll.u32 (!%p239_p2), %s1769_s25, 4 }
   0x6   : > { %242 = sbr.rel (%p239_p2) target bundleno = 1062 (0x426), region = 48  ;;  %p271_p3 = scmp.lt.s32.totalorder (!%p239_p2), %s1774_s19, 31 }
   0xb   : > { %v313_v0 = vld [vmem:[%s3138_s1 + $0x78] sm:$0xff]  ;;  %v312_v1 = vld [vmem:[%s3138_s1 + $0x70] sm:$0xff]  ;;  %v311_v2 = vld [vmem:[%s3138_s1 + $0x68] sm:$0xff]  ;;  %s3200_s19 = smov (!%p271_p3, %s1774_s19), 31  ;;  %v2081_v32 = vmov 1   ;;  %v2082_v33 = vmov 0  }
   0xc   : > { %314 = vmatpush.msra.mxu0 %v313_v0  ;;  %1878 = vmatpush.msra.mxu1 %v313_v0  ;;  %v310_v3 = vld [vmem:[%s3138_s1 + $0x60] sm:$0xff]  ;;  %v309_v4 = vld [vmem:[%s3138_s1 + $0x58] sm:$0xff]  ;;  %v308_v5 = vld [vmem:[%s3138_s1 + $0x50] sm:$0xff]  ;;  %s1775_s8 = sshll.u32 %s3200_s19, 3  ;;  %vm707_vm0 = vcmask 1043456   ;;  %vm658_vm1 = vcmask 31744  }
   0xd   : > { %v307_v6 = vld [vmem:[%s3138_s1 + $0x48] sm:$0xff]  ;;  %v306_v7 = vld [vmem:[%s3138_s1 + $0x40] sm:$0xff]  ;;  %v305_v8 = vld [vmem:[%s3138_s1 + $0x38] sm:$0xff]  ;;  %s2184_s15 = scalar_lea.vmem %s3137_s0, %s1775_s8  ;;  %1907 = vset.pattern.permute.xlu1 %v2081_v32  ;;  %1906 = vset.pattern.permute.xlu0 %v2082_v33  ;;  %vm1612_vm2 = vcmask 1041408   ;;  %vm1545_vm3 = vcmask 7168   ;;  %vm1563_vm4 = vcmask 15360   ;;  %s3100_s12 = scalar_lea.vmem %s3144_s7, %s1775_s8 }
   0xe   : > { %315 = vmatpush.msra.mxu0 %v312_v1  ;;  %1879 = vmatpush.msra.mxu1 %v312_v1  ;;  %v304_v9 = vld [vmem:[%s3138_s1 + $0x30] sm:$0xff]  ;;  %v303_v10 = vld [vmem:[%s3138_s1 + $0x28] sm:$0xff]  ;;  %v302_v11 = vld [vmem:[%s3138_s1 + $0x20] sm:$0xff] }
   0xf   : > { %v301_v12 = vld [vmem:[%s3138_s1 + $0x18] sm:$0xff]  ;;  %v300_v13 = vld [vmem:[%s3138_s1 + $0x10] sm:$0xff]  ;;  %v299_v14 = vld [vmem:[%s3138_s1 + $0x8] sm:$0xff]  ;;  %1909 = vset.pattern.permute.xlu2 %v2081_v32 }
  0x10   : > { %316 = vmatpush.msra.mxu0 %v311_v2  ;;  %1880 = vmatpush.msra.mxu1 %v311_v2  ;;  %v298_v15 = vld [vmem:[%s3138_s1] sm:$0xff]  ;;  %v293_v17 = vld [vmem:[%s2184_s15 + $0x58] sm:$0xff]  ;;  %v283_v18 = vld [vmem:[%s2184_s15 + $0x8] sm:$0xff] }
  0x11   : > { %v282_v16 = vld [vmem:[%s2184_s15] sm:$0xff]  ;;  %v284_v20 = vld [vmem:[%s2184_s15 + $0x10] sm:$0xff]  ;;  %v295_v21 = vld [vmem:[%s2184_s15 + $0x68] sm:$0xff] }
  0x12   : > { %317 = vmatpush.msra.mxu0 %v310_v3  ;;  %1881 = vmatpush.msra.mxu1 %v310_v3  ;;  %v294_v19 = vld [vmem:[%s2184_s15 + $0x60] sm:$0xff]  ;;  %v285_v22 = vld [vmem:[%s2184_s15 + $0x18] sm:$0xff]  ;;  %v296_v23 = vld [vmem:[%s2184_s15 + $0x70] sm:$0xff] }
  0x13   : > { %v286_v24 = vld [vmem:[%s2184_s15 + $0x20] sm:$0xff]  ;;  %v297_v25 = vld [vmem:[%s2184_s15 + $0x78] sm:$0xff]  ;;  %v287_v26 = vld [vmem:[%s2184_s15 + $0x28] sm:$0xff] }
  0x14   : > { %318 = vmatpush.msra.mxu0 %v309_v4  ;;  %1882 = vmatpush.msra.mxu1 %v309_v4  ;;  %v288_v27 = vld [vmem:[%s2184_s15 + $0x30] sm:$0xff]  ;;  %v289_v28 = vld [vmem:[%s2184_s15 + $0x38] sm:$0xff]  ;;  %v290_v29 = vld [vmem:[%s2184_s15 + $0x40] sm:$0xff] }
  0x15   : > { %v291_v30 = vld [vmem:[%s2184_s15 + $0x48] sm:$0xff]  ;;  %v292_v31 = vld [vmem:[%s2184_s15 + $0x50] sm:$0xff] }
  0x16   : > { %319 = vmatpush.msra.mxu0 %v308_v5  ;;  %1883 = vmatpush.msra.mxu1 %v308_v5 }
  0x18   : > { %320 = vmatpush.msra.mxu0 %v307_v6  ;;  %1884 = vmatpush.msra.mxu1 %v307_v6 }
  0x1a   : > { %321 = vmatpush.msra.mxu0 %v306_v7  ;;  %1885 = vmatpush.msra.mxu1 %v306_v7 }
  0x1c   : > { %322 = vmatpush.msra.mxu0 %v305_v8  ;;  %1886 = vmatpush.msra.mxu1 %v305_v8 }
  0x1e   : > { %323 = vmatpush.msra.mxu0 %v304_v9  ;;  %1887 = vmatpush.msra.mxu1 %v304_v9 }
  0x20   : > { %324 = vmatpush.msra.mxu0 %v303_v10  ;;  %1888 = vmatpush.msra.mxu1 %v303_v10 }
  0x22   : > { %325 = vmatpush.msra.mxu0 %v302_v11  ;;  %1889 = vmatpush.msra.mxu1 %v302_v11 }
  0x24   : > { %326 = vmatpush.msra.mxu0 %v301_v12  ;;  %1890 = vmatpush.msra.mxu1 %v301_v12  ;;  %v410_v12 = vld [vmem:[%s3142_s5 + $0x78] sm:$0xff] }
  0x26   : > { %327 = vmatpush.msra.mxu0 %v300_v13  ;;  %1891 = vmatpush.msra.mxu1 %v300_v13  ;;  %v1792_v13 = vld [vmem:[%s3142_s5 + $0xf0] sm:$0xff] }
  0x28   : > { %328 = vmatpush.msra.mxu0 %v299_v14  ;;  %1892 = vmatpush.msra.mxu1 %v299_v14  ;;  %v1793_v14 = vld [vmem:[%s3142_s5 + $0xf8] sm:$0xff] }
  0x2a   : > { %329 = vmatpush.msra.mxu0 %v298_v15  ;;  %1893 = vmatpush.msra.mxu1 %v298_v15 }
  0x2b   : > { %330 = vmatmul.f32.vlgmr.msra.gmra.mxu0 %v282_v16  ;;  %363 = vmatmul.f32.vlgmr.msra.gmra.mxu1 %v293_v17  ;;  %v1791_v16 = vld [vmem:[%s3142_s5 + $0xe8] sm:$0xff] }
  0x33   : > { %333 = vmatmul.f32.gmra.mxu0 %v283_v18  ;;  %366 = vmatmul.f32.gmra.mxu1 %v294_v19  ;;  %v409_v18 = vld [vmem:[%s3142_s5 + $0x70] sm:$0xff] }
  0x3b   : > { %336 = vmatmul.f32.gmra.mxu0 %v284_v20  ;;  %369 = vmatmul.f32.gmra.mxu1 %v295_v21 }
  0x43   : > { %339 = vmatmul.f32.gmra.mxu0 %v285_v22  ;;  %372 = vmatmul.f32.gmra.mxu1 %v296_v23  ;;  %v408_v23 = vld [vmem:[%s3142_s5 + $0x68] sm:$0xff] }
  0x4b   : > { %342 = vmatmul.f32.gmra.mxu0 %v286_v24  ;;  %375 = vmatmul.f32.gmra.mxu1 %v297_v25  ;;  %v407_v24 = vld [vmem:[%s3142_s5 + $0x60] sm:$0xff] }
  0x53   : > { %345 = vmatmul.f32.gmra.mxu0 %v287_v26 }
  0x5b   : > { %348 = vmatmul.f32.gmra.mxu0 %v288_v27 }
  0x63   : > { %351 = vmatmul.f32.gmra.mxu0 %v289_v28  ;;  %v1790_v28 = vld [vmem:[%s3142_s5 + $0xe0] sm:$0xff] }
  0x6b   : > { %354 = vmatmul.f32.gmra.mxu0 %v290_v29  ;;  %v1789_v29 = vld [vmem:[%s3142_s5 + $0xd8] sm:$0xff] }
  0x73   : > { %357 = vmatmul.f32.gmra.mxu0 %v291_v30  ;;  %v406_v30 = vld [vmem:[%s3142_s5 + $0x58] sm:$0xff] }
  0x7b   : > { %360 = vmatmul.f32.gmra.mxu0 %v292_v31 }
  0xa8   : > { %v2208_v34 = vpop.f32.mrf.mxu0  ;;  %v364_v35 = vpop.f32.mrf.mxu1 }
  0xa9   : > { %v390_v36 = vmul.f32 0.015625, %v364_v35  ;;  %v379_v1 = vmul.f32 0.015625, %v2208_v34 }
  0xab   : > { %569 = vperm.xlu1 %1907, %v390_v36   ;;  %468 = vperm.xlu0 %1906, %v390_v36  }
  0xb0   : > { %v334_v37 = vpop.f32.mrf.mxu0  ;;  %v367_v38 = vpop.f32.mrf.mxu1 }
  0xb1   : > { %v391_v39 = vmul.f32 0.015625, %v367_v38  ;;  %v380_v63 = vmul.f32 0.015625, %v334_v37 }
  0xb3   : > { %1908 = vset.pattern.permute.xlu1 %v2082_v33  ;;  %573 = vperm.xlu2 %1909, %v391_v39  }
  0xb4   : > { %473 = vperm.xlu1 %1908, %v391_v39  }
  0xb8   : > { %v337_v40 = vpop.f32.mrf.mxu0  ;;  %v370_v41 = vpop.f32.mrf.mxu1 }
  0xb9   : > { %v392_v42 = vmul.f32 0.015625, %v370_v41  ;;  %v381_v0 = vmul.f32 0.015625, %v337_v40 }
  0xbb   : > { %1910 = vset.pattern.permute.xlu2 %v2082_v33 }
  0xbc   : > { %478 = vperm.xlu2 %1910, %v392_v42  }
  0xc0   : > { %v340_v43 = vpop.f32.mrf.mxu0  ;;  %v373_v44 = vpop.f32.mrf.mxu1 }
  0xc1   : > { %v393_v45 = vmul.f32 0.015625, %v373_v44  ;;  %v382_v52 = vmul.f32 0.015625, %v340_v43 }
  0xc3   : > { %483 = vperm.xlu1 %1908, %v393_v45  }
  0xc4   : > { %1911 = vset.pattern.permute.xlu2 %v2081_v32 }
  0xc5   : > { %577 = vperm.xlu2 %1911, %v392_v42  }
  0xc8   : > { %v343_v46 = vpop.f32.mrf.mxu0  ;;  %v376_v47 = vpop.f32.mrf.mxu1 }
  0xc9   : > { %v394_v48 = vmul.f32 0.015625, %v376_v47  ;;  %v383_v49 = vmul.f32 0.015625, %v343_v46 }
  0xcb   : > { %1912 = vset.pattern.permute.xlu1 %v2081_v32  ;;  %488 = vperm.xlu0 %1906, %v394_v48  }
  0xcc   : > { %581 = vperm.xlu1 %1912, %v393_v45  }
  0xcd   : > { %1915 = vset.pattern.permute.xlu2 %v2082_v33 }
  0xce   : > { %433 = vperm.xlu2 %1915, %v383_v49  }
  0xd0   : > { %v346_v50 = vpop.f32.mrf.mxu0 }
  0xd1   : > { %v384_v51 = vmul.f32 0.015625, %v346_v50  ;;  %v405_v50 = vld [vmem:[%s3142_s5 + $0x50] sm:$0xff] }
  0xd3   : > { %1914 = vset.pattern.permute.xlu0 %v2081_v32 }
  0xd4   : > { %1913 = vset.pattern.permute.xlu1 %v2082_v33  ;;  %585 = vperm.xlu0 %1914, %v394_v48  }
  0xd5   : > { %428 = vperm.xlu1 %1913, %v382_v52  }
  0xd6   : > { %438 = vperm.xlu2 %1915, %v384_v51  }
  0xd8   : > { %v349_v53 = vpop.f32.mrf.mxu0 }
  0xd9   : > { %v385_v56 = vmul.f32 0.015625, %v349_v53  ;;  %v1788_v53 = vld [vmem:[%s3142_s5 + $0xd0] sm:$0xff] }
  0xdc   : > { %541 = vperm.xlu0 %1914, %v383_v49  }
  0xdd   : > { %1916 = vset.pattern.permute.xlu1 %v2081_v32 }
  0xde   : > { %545 = vperm.xlu1 %1916, %v384_v51   ;;  %1919 = vset.pattern.permute.xlu2 %v2081_v32  ;;  %v1787_v51 = vld [vmem:[%s3142_s5 + $0xc8] sm:$0xff] }
  0xe0   : > { %v352_v54 = vpop.f32.mrf.mxu0 }
  0xe1   : > { %v386_v55 = vmul.f32 0.015625, %v352_v54  ;;  %v404_v54 = vld [vmem:[%s3142_s5 + $0x48] sm:$0xff] }
  0xe3   : > { %553 = vperm.xlu2 %1919, %v386_v55  }
  0xe4   : > { %1917 = vset.pattern.permute.xlu0 %v2082_v33 }
  0xe5   : > { %443 = vperm.xlu0 %1917, %v385_v56  }
  0xe6   : > { %549 = vperm.xlu1 %1916, %v385_v56  }
  0xe8   : > { %v355_v57 = vpop.f32.mrf.mxu0 }
  0xe9   : > { %v387_v58 = vmul.f32 0.015625, %v355_v57 }
  0xeb   : > { %557 = vperm.xlu2 %1919, %v387_v58  }
  0xed   : > { %1921 = vset.pattern.permute.xlu0 %v2081_v32 }
  0xee   : > { %1918 = vset.pattern.permute.xlu1 %v2082_v33 }
  0xef   : > { %448 = vperm.xlu1 %1918, %v386_v55   ;;  %v403_v55 = vld [vmem:[%s3142_s5 + $0x40] sm:$0xff] }
  0xf0   : > { %v358_v59 = vpop.f32.mrf.mxu0 }
  0xf1   : > { %v388_v60 = vmul.f32 0.015625, %v358_v59 }
  0xf3   : > { %1920 = vset.pattern.permute.xlu2 %v2082_v33  ;;  %561 = vperm.xlu0 %1921, %v388_v60  }
  0xf4   : > { %458 = vperm.xlu2 %1920, %v388_v60   ;;  %v1786_v60 = vld [vmem:[%s3142_s5 + $0xc0] sm:$0xff] }
  0xf7   : > { %453 = vperm.xlu1 %1918, %v387_v58  }
  0xf8   : > { %v361_v61 = vpop.f32.mrf.mxu0 }
  0xf9   : > { %v389_v62 = vmul.f32 0.015625, %v361_v61  ;;  %v402_v61 = vld [vmem:[%s3142_s5 + $0x38] sm:$0xff] }
  0xfb   : > { %1925 = vset.pattern.permute.xlu0 %v2082_v33 }
  0xfc   : > { %418 = vperm.xlu0 %1925, %v380_v63   ;;  %463 = vperm.xlu2 %1920, %v389_v62  }
  0xff   : > { %1923 = vset.pattern.permute.xlu1 %v2081_v32 }
 0x100   : > { %565 = vperm.xlu1 %1923, %v389_v62  }
 0x104   : > { %1922 = vset.pattern.permute.xlu2 %v2081_v32  ;;  %1928 = vset.pattern.permute.xlu0 %v2081_v32 }
 0x105   : > { %537 = vperm.xlu2 %1922, %v382_v52  }
 0x108   : > { %1924 = vset.pattern.permute.xlu1 %v2082_v33 }
 0x109   : > { %423 = vperm.xlu1 %1924, %v381_v0  }
 0x10d   : > { %533 = vperm.xlu2 %1922, %v381_v0   ;;  %v574_v2 = vpop.permute.xlu2 %573 }
 0x10e   : > { %v600_v34 = vmul.f32 %v1790_v28, %v574_v2  ;;  %v401_v2 = vld [vmem:[%s3142_s5 + $0x30] sm:$0xff] }
 0x111   : > { %1926 = vset.pattern.permute.xlu1 %v2081_v32 }
 0x112   : > { %529 = vperm.xlu1 %1926, %v380_v63  }
 0x115   : > { %1927 = vset.pattern.permute.xlu2 %v2082_v33 }
 0x116   : > { %413 = vperm.xlu2 %1927, %v379_v1   ;;  %v479_v4 = vpop.permute.xlu2 %478 }
 0x117   : > { %v504_v31 = vmul.f32 %v479_v4, %v408_v23 }
 0x11a   : > { %525 = vperm.xlu1 %1926, %v379_v1   ;;  %v1785_v1 = vld [vmem:[%s3142_s5 + $0xb8] sm:$0xff] }
 0x11d   : > { %v570_v3 = vpop.permute.xlu1 %569  ;;  %v469_v7 = vpop.permute.xlu0 %468 }
 0x11e   : > { %v599_v35 = vmul.f32 %v1789_v29, %v570_v3  ;;  %v502_v36 = vmul.f32 %v469_v7, %v406_v30  ;;  %v1784_v3 = vld [vmem:[%s3142_s5 + $0xb0] sm:$0xff] }
 0x11f   : > { %v578_v6 = vpop.permute.xlu2 %577 }
 0x120   : > { %v601_v25 = vmul.f32 %v1791_v16, %v578_v6  ;;  %v615_v41 = vadd.f32 %v599_v35, %v502_v36  ;;  %v396_v35 = vld [vmem:[%s3142_s5 + $0x8] sm:$0xff] }
 0x122   : > { %v617_v37 = vadd.f32 %v601_v25, %v504_v31 }
 0x126   : > { %v474_v5 = vpop.permute.xlu1 %473 }
 0x127   : > { %v503_v32 = vmul.f32 %v474_v5, %v407_v24 }
 0x128   : > { %v2231_v9 = vpop.permute.xlu2 %433 }
 0x129   : > { %v616_v39 = vadd.f32 %v600_v34, %v503_v32 }
 0x130   : > { %v2245_v17 = vpop.permute.xlu2 %438 }
 0x135   : > { %v484_v8 = vpop.permute.xlu1 %483 }
 0x136   : > { %v505_v26 = vmul.f32 %v484_v8, %v409_v18  ;;  %v1783_v8 = vld [vmem:[%s3142_s5 + $0xa8] sm:$0xff] }
 0x13d   : > { %v489_v10 = vpop.permute.xlu0 %488  ;;  %v554_v38 = vpop.permute.xlu2 %553 }
 0x13e   : > { %v582_v11 = vpop.permute.xlu1 %581  ;;  %v506_v15 = vmul.f32 %v489_v10, %v410_v12  ;;  %v595_v10 = vmul.f32 %v1785_v1, %v554_v38  ;;  %v654_v1 = vld [vmem:[%s3141_s4 + $0x60] sm:$0xff] }
 0x13f   : > { %v602_v20 = vmul.f32 %v1792_v13, %v582_v11 }
 0x141   : > { %v618_v33 = vadd.f32 %v602_v20, %v505_v26  ;;  %v399_v20 = vld [vmem:[%s3142_s5 + $0x20] sm:$0xff]  ;;  %v398_v26 = vld [vmem:[%s3142_s5 + $0x18] sm:$0xff] }
 0x142   : > { %v495_v28 = vmul.f32 %v2231_v9, %v399_v20  ;;  %v1779_v9 = vld [vmem:[%s3142_s5 + $0x88] sm:$0xff] }
 0x145   : > { %v558_v42 = vpop.permute.xlu2 %557 }
 0x146   : > { %v586_v19 = vpop.permute.xlu0 %585  ;;  %v596_v5 = vmul.f32 %v1786_v60, %v558_v42  ;;  %v650_v60 = vld [vmem:[%s3141_s4 + $0x40] sm:$0xff] }
 0x147   : > { %v603_v21 = vmul.f32 %v1793_v14, %v586_v19  ;;  %v2250_v22 = vpop.permute.xlu1 %428  ;;  %v400_v14 = vld [vmem:[%s3142_s5 + $0x28] sm:$0xff] }
 0x148   : > { %v496_v23 = vmul.f32 %v2245_v17, %v400_v14  ;;  %v1780_v17 = vld [vmem:[%s3142_s5 + $0x90] sm:$0xff]  ;;  %v494_v32 = vmul.f32 %v2250_v22, %v398_v26 }
 0x149   : > { %v619_v27 = vadd.f32 %v603_v21, %v506_v15  ;;  %v1782_v15 = vld [vmem:[%s3142_s5 + $0xa0] sm:$0xff]  ;;  %v1781_v21 = vld [vmem:[%s3142_s5 + $0x98] sm:$0xff]  ;;  %v1829_v14 = vld [vmem:[%s3143_s6 + $0x90] sm:$0xff] }
 0x14b   : > { %621 = vmatpush.msrb.mxu1 %v619_v27  ;;  %v397_v27 = vld [vmem:[%s3142_s5 + $0x10] sm:$0xff] }
 0x14d   : > { %622 = vmatpush.msrb.mxu1 %v618_v33 }
 0x14e   : > { %v542_v44 = vpop.permute.xlu0 %541  ;;  %v459_v46 = vpop.permute.xlu2 %458 }
 0x14f   : > { %623 = vmatpush.msrb.mxu1 %v617_v37  ;;  %v500_v62 = vmul.f32 %v459_v46, %v404_v54  ;;  %v592_v24 = vmul.f32 %v1782_v15, %v542_v44  ;;  %v644_v54 = vld [vmem:[%s3141_s4 + $0x10] sm:$0xff] }
 0x150   : > { %v546_v40 = vpop.permute.xlu1 %545 }
 0x151   : > { %624 = vmatpush.msrb.mxu1 %v616_v39  ;;  %v593_v16 = vmul.f32 %v1783_v8, %v546_v40  ;;  %v608_v34 = vadd.f32 %v592_v24, %v495_v28 }
 0x153   : > { %625 = vmatpush.msrb.mxu1 %v615_v41  ;;  %v609_v30 = vadd.f32 %v593_v16, %v496_v23  ;;  %v1830_v23 = vld [vmem:[%s3143_s6 + $0x98] sm:$0xff] }
 0x156   : > { %v464_v49 = vpop.permute.xlu2 %463 }
 0x157   : > { %v444_v47 = vpop.permute.xlu0 %443  ;;  %v501_v57 = vmul.f32 %v464_v49, %v405_v50  ;;  %v620_v50 = vld [vmem:[%s3140_s3] sm:$0xf] }
 0x158   : > { %v550_v43 = vpop.permute.xlu1 %549  ;;  %v497_v11 = vmul.f32 %v444_v47, %v401_v2  ;;  %v655_v2 = vld [vmem:[%s3141_s4 + $0x68] sm:$0xff] }
 0x159   : > { %v594_v12 = vmul.f32 %v1784_v3, %v550_v43  ;;  %v395_v43 = vld [vmem:[%s3142_s5] sm:$0xff]  ;;  %v656_v3 = vld [vmem:[%s3141_s4 + $0x70] sm:$0xff] }
 0x15b   : > { %v610_v25 = vadd.f32 %v594_v12, %v497_v11 }
 0x15f   : > { %v538_v4 = vpop.permute.xlu2 %537 }
 0x160   : > { %v591_v29 = vmul.f32 %v1781_v21, %v538_v4  ;;  %v657_v4 = vld [vmem:[%s3141_s4 + $0x78] sm:$0xff] }
 0x161   : > { %v449_v45 = vpop.permute.xlu1 %448  ;;  %v779_v21 = vld [vmem:[%s3143_s6 + $0x18] sm:$0xff] }
 0x162   : > { %v498_v6 = vmul.f32 %v449_v45, %v402_v61  ;;  %v607_v38 = vadd.f32 %v591_v29, %v494_v32  ;;  %v1778_v45 = vld [vmem:[%s3142_s5 + $0x80] sm:$0xff]  ;;  %v651_v61 = vld [vmem:[%s3141_s4 + $0x48] sm:$0xff] }
 0x163   : > { %v780_v29 = vld [vmem:[%s3143_s6 + $0x20] sm:$0xff] }
 0x164   : > { %v611_v19 = vadd.f32 %v595_v10, %v498_v6  ;;  %v1828_v6 = vld [vmem:[%s3143_s6 + $0x88] sm:$0xff] }
 0x165   : > { %v562_v52 = vpop.permute.xlu0 %561 }
 0x166   : > { %v597_v58 = vmul.f32 %v1787_v51, %v562_v52 }
 0x167   : > { %v534_v31 = vpop.permute.xlu2 %533 }
 0x168   : > { %v613_v7 = vadd.f32 %v597_v58, %v500_v62  ;;  %v590_v37 = vmul.f32 %v1780_v17, %v534_v31  ;;  %v648_v58 = vld [vmem:[%s3141_s4 + $0x30] sm:$0xff] }
 0x169   : > { %v454_v48 = vpop.permute.xlu1 %453  ;;  %v652_v62 = vld [vmem:[%s3141_s4 + $0x50] sm:$0xff] }
 0x16a   : > { %v499_v63 = vmul.f32 %v454_v48, %v403_v55  ;;  %v645_v55 = vld [vmem:[%s3141_s4 + $0x18] sm:$0xff] }
 0x16c   : > { %v612_v13 = vadd.f32 %v596_v5, %v499_v63  ;;  %v653_v63 = vld [vmem:[%s3141_s4 + $0x58] sm:$0xff]  ;;  %v777_v5 = vld [vmem:[%s3143_s6 + $0x8] sm:$0xff] }
 0x16e   : > { %v419_v36 = vpop.permute.xlu0 %418 }
 0x16f   : > { %v492_v40 = vmul.f32 %v419_v36, %v396_v35  ;;  %v781_v35 = vld [vmem:[%s3143_s6 + $0x28] sm:$0xff] }
 0x170   : > { %v414_v44 = vpop.permute.xlu2 %413  ;;  %v1832_v36 = vld [vmem:[%s3143_s6 + $0xa8] sm:$0xff] }
 0x171   : > { %v491_v47 = vmul.f32 %v414_v44, %v395_v43 }
 0x172   : > { %v566_v56 = vpop.permute.xlu1 %565 }
 0x173   : > { %v598_v59 = vmul.f32 %v1788_v53, %v566_v56  ;;  %v643_v53 = vld [vmem:[%s3141_s4 + $0x8] sm:$0xff]  ;;  %v646_v56 = vld [vmem:[%s3141_s4 + $0x20] sm:$0xff] }
 0x175   : > { %v614_v0 = vadd.f32 %v598_v59, %v501_v57  ;;  %v647_v57 = vld [vmem:[%s3141_s4 + $0x28] sm:$0xff]  ;;  %v649_v59 = vld [vmem:[%s3141_s4 + $0x38] sm:$0xff] }
 0x177   : > { %626 = vmatpush.msrb.mxu1 %v614_v0  ;;  %v642_v0 = vld [vmem:[%s3141_s4] sm:$0xff] }
 0x179   : > { %627 = vmatpush.msrb.mxu1 %v613_v7 }
 0x17b   : > { %v424_v18 = vpop.permute.xlu1 %423  ;;  %628 = vmatpush.msrb.mxu1 %v612_v13  ;;  %v778_v13 = vld [vmem:[%s3143_s6 + $0x10] sm:$0xff] }
 0x17c   : > { %v493_v33 = vmul.f32 %v424_v18, %v397_v27 }
 0x17d   : > { %629 = vmatpush.msrb.mxu1 %v611_v19 }
 0x17e   : > { %v606_v22 = vadd.f32 %v590_v37, %v493_v33 }
 0x17f   : > { %630 = vmatpush.msrb.mxu1 %v610_v25 }
 0x181   : > { %631 = vmatpush.msrb.mxu1 %v609_v30  ;;  %v1831_v30 = vld [vmem:[%s3143_s6 + $0xa0] sm:$0xff] }
 0x183   : > { %632 = vmatpush.msrb.mxu1 %v608_v34 }
 0x184   : > { %v530_v39 = vpop.permute.xlu1 %529 }
 0x185   : > { %v589_v41 = vmul.f32 %v1779_v9, %v530_v39  ;;  %633 = vmatpush.msrb.mxu1 %v607_v38 }
 0x187   : > { %634 = vmatpush.msrb.mxu1 %v606_v22  ;;  %v605_v42 = vadd.f32 %v589_v41, %v492_v40  ;;  %v782_v41 = vld [vmem:[%s3143_s6 + $0x30] sm:$0xff] }
 0x188   : > { %v1833_v22 = vld [vmem:[%s3143_s6 + $0xb0] sm:$0xff] }
 0x189   : > { %635 = vmatpush.msrb.mxu1 %v605_v42 }
 0x18c   : > { %v526_v46 = vpop.permute.xlu1 %525 }
 0x18d   : > { %v588_v48 = vmul.f32 %v1778_v45, %v526_v46 }
 0x18f   : > { %v604_v49 = vadd.f32 %v588_v48, %v491_v47  ;;  %v783_v47 = vld [vmem:[%s3143_s6 + $0x38] sm:$0xff] }
 0x190   : > { %v1834_v48 = vld [vmem:[%s3143_s6 + $0xb8] sm:$0xff] }
 0x191   : > { %636 = vmatpush.msrb.mxu1 %v604_v49 }
 0x192   : > { %637 = vmatmul.f32.vlgmr.msrb.gmra.mxu1 %v620_v50 }
 0x20f   : > { %v638_v51 = vpop.f32.mrf.mxu1 }
 0x210   : > { %v641_v52 = vmax.f32 %v638_v51, 0.0 }
 0x212   : > { %1894 = vmatpush.msk.msra.mxu2 %vm707_vm0, %v641_v52  ;;  %1794 = vmatpush.msk.msra.mxu1 %vm707_vm0, %v641_v52 }
 0x213   : > { %1796 = vmatmul.msk.f32.vlgmr.msra.gmra.mxu2 %vm658_vm1, %v643_v53  ;;  %1795 = vmatmul.msk.f32.vlgmr.msra.gmra.mxu1 %vm658_vm1, %v642_v0 }
 0x21b   : > { %1797 = vmatmul.msk.f32.gmra.mxu2 %vm658_vm1, %v644_v54  ;;  %v784_v54 = vld [vmem:[%s3143_s6 + $0x40] sm:$0xff] }
 0x223   : > { %1798 = vmatmul.msk.f32.gmra.mxu2 %vm658_vm1, %v645_v55  ;;  %v1835_v55 = vld [vmem:[%s3143_s6 + $0xc0] sm:$0xff] }
 0x22b   : > { %1799 = vmatmul.msk.f32.gmra.mxu2 %vm658_vm1, %v646_v56 }
 0x233   : > { %1800 = vmatmul.msk.f32.gmra.mxu2 %vm658_vm1, %v647_v57 }
 0x23b   : > { %1801 = vmatmul.msk.f32.gmra.mxu2 %vm658_vm1, %v648_v58 }
 0x243   : > { %1802 = vmatmul.msk.f32.gmra.mxu2 %vm658_vm1, %v649_v59 }
 0x24b   : > { %1803 = vmatmul.msk.f32.gmra.mxu2 %vm658_vm1, %v650_v60 }
 0x253   : > { %1804 = vmatmul.msk.f32.gmra.mxu2 %vm658_vm1, %v651_v61  ;;  %v785_v61 = vld [vmem:[%s3143_s6 + $0x48] sm:$0xff] }
 0x25b   : > { %1805 = vmatmul.msk.f32.gmra.mxu2 %vm658_vm1, %v652_v62  ;;  %v1836_v62 = vld [vmem:[%s3143_s6 + $0xc8] sm:$0xff] }
 0x263   : > { %1806 = vmatmul.msk.f32.gmra.mxu2 %vm658_vm1, %v653_v63 }
 0x26b   : > { %1807 = vmatmul.msk.f32.gmra.mxu2 %vm658_vm1, %v654_v1 }
 0x273   : > { %1808 = vmatmul.msk.f32.gmra.mxu2 %vm658_vm1, %v655_v2 }
 0x27b   : > { %1809 = vmatmul.msk.f32.gmra.mxu2 %vm658_vm1, %v656_v3 }
 0x283   : > { %1810 = vmatmul.msk.f32.gmra.mxu2 %vm658_vm1, %v657_v4  ;;  %v786_v4 = vld [vmem:[%s3143_s6 + $0x50] sm:$0xff] }
 0x296   : > { %v731_v7 = vpop.f32.mrf.mxu2 }
 0x297   : > { %v793_v8 = vmul.f32 %v777_v5, %v731_v7  ;;  %v1178_v10 = vmul.f32 %v1828_v6, %v731_v7  ;;  %v1837_v5 = vld [vmem:[%s3143_s6 + $0xd0] sm:$0xff] }
 0x299   : > { %v1196_v11 = vsel %vm658_vm1, %v1178_v10, 0.0  ;;  %v811_v12 = vsel %vm658_vm1, %v793_v8, 0.0 }
 0x29a   : > { %1197 = vadd.xlane.f32.xlu0 %v1196_v11  ;;  %812 = vadd.xlane.f32.xlu2 %v811_v12  ;;  %v787_v12 = vld [vmem:[%s3143_s6 + $0x58] sm:$0xff] }
 0x29e   : > { %v734_v15 = vpop.f32.mrf.mxu2 }
 0x29f   : > { %v794_v16 = vmul.f32 %v778_v13, %v734_v15  ;;  %v1179_v18 = vmul.f32 %v1829_v14, %v734_v15  ;;  %v1838_v13 = vld [vmem:[%s3143_s6 + $0xd8] sm:$0xff] }
 0x2a1   : > { %v1199_v19 = vsel %vm658_vm1, %v1179_v18, 0.0  ;;  %v814_v20 = vsel %vm658_vm1, %v794_v16, 0.0 }
 0x2a2   : > { %1200 = vadd.xlane.f32.xlu2 %v1199_v19  ;;  %815 = vadd.xlane.f32.xlu1 %v814_v20  ;;  %v788_v20 = vld [vmem:[%s3143_s6 + $0x60] sm:$0xff] }
 0x2a6   : > { %v737_v24 = vpop.f32.mrf.mxu2 }
 0x2a7   : > { %v795_v25 = vmul.f32 %v779_v21, %v737_v24  ;;  %v1180_v26 = vmul.f32 %v1830_v23, %v737_v24  ;;  %v1839_v21 = vld [vmem:[%s3143_s6 + $0xe0] sm:$0xff] }
 0x2a9   : > { %v1202_v27 = vsel %vm658_vm1, %v1180_v26, 0.0  ;;  %v817_v28 = vsel %vm658_vm1, %v795_v25, 0.0 }
 0x2aa   : > { %1203 = vadd.xlane.f32.xlu0 %v1202_v27  ;;  %818 = vadd.xlane.f32.xlu2 %v817_v28  ;;  %v789_v28 = vld [vmem:[%s3143_s6 + $0x68] sm:$0xff] }
 0x2ae   : > { %v740_v17 = vpop.f32.mrf.mxu2 }
 0x2af   : > { %v796_v31 = vmul.f32 %v780_v29, %v740_v17  ;;  %v1181_v32 = vmul.f32 %v1831_v30, %v740_v17  ;;  %v1840_v29 = vld [vmem:[%s3143_s6 + $0xe8] sm:$0xff] }
 0x2b1   : > { %v1205_v33 = vsel %vm658_vm1, %v1181_v32, 0.0  ;;  %v820_v34 = vsel %vm658_vm1, %v796_v31, 0.0 }
 0x2b2   : > { %1206 = vadd.xlane.f32.xlu2 %v1205_v33  ;;  %821 = vadd.xlane.f32.xlu1 %v820_v34  ;;  %v790_v34 = vld [vmem:[%s3143_s6 + $0x70] sm:$0xff] }
 0x2b6   : > { %v743_v9 = vpop.f32.mrf.mxu2 }
 0x2b7   : > { %v797_v37 = vmul.f32 %v781_v35, %v743_v9  ;;  %v1182_v38 = vmul.f32 %v1832_v36, %v743_v9  ;;  %v1841_v35 = vld [vmem:[%s3143_s6 + $0xf0] sm:$0xff] }
 0x2b9   : > { %v1208_v39 = vsel %vm658_vm1, %v1182_v38, 0.0  ;;  %v823_v40 = vsel %vm658_vm1, %v797_v37, 0.0 }
 0x2ba   : > { %1209 = vadd.xlane.f32.xlu1 %v1208_v39  ;;  %824 = vadd.xlane.f32.xlu0 %v823_v40  ;;  %v728_v40 = vpop.f32.mrf.mxu1 }
 0x2be   : > { %v746_v42 = vpop.f32.mrf.mxu2 }
 0x2bf   : > { %v798_v43 = vmul.f32 %v782_v41, %v746_v42  ;;  %v1183_v44 = vmul.f32 %v1833_v22, %v746_v42  ;;  %v776_v41 = vld [vmem:[%s3143_s6] sm:$0xff]  ;;  %v791_v42 = vld [vmem:[%s3143_s6 + $0x78] sm:$0xff] }
 0x2c0   : > { %v792_v22 = vmul.f32 %v776_v41, %v728_v40 }
 0x2c1   : > { %v1211_v45 = vsel %vm658_vm1, %v1183_v44, 0.0  ;;  %v826_v46 = vsel %vm658_vm1, %v798_v43, 0.0  ;;  %v1842_v43 = vld [vmem:[%s3143_s6 + $0xf8] sm:$0xff] }
 0x2c2   : > { %1212 = vadd.xlane.f32.xlu0 %v1211_v45  ;;  %827 = vadd.xlane.f32.xlu2 %v826_v46 }
 0x2c6   : > { %v749_v49 = vpop.f32.mrf.mxu2 }
 0x2c7   : > { %v799_v50 = vmul.f32 %v783_v47, %v749_v49  ;;  %v1184_v51 = vmul.f32 %v1834_v48, %v749_v49  ;;  %v1827_v47 = vld [vmem:[%s3143_s6 + $0x80] sm:$0xff]  ;;  %v808_v48 = vsel %vm658_vm1, %v792_v22, 0.0 }
 0x2c9   : > { %v1214_v52 = vsel %vm658_vm1, %v1184_v51, 0.0  ;;  %v829_v53 = vsel %vm658_vm1, %v799_v50, 0.0  ;;  %v1177_v51 = vmul.f32 %v1827_v47, %v728_v40 }
 0x2ca   : > { %1215 = vadd.xlane.f32.xlu2 %v1214_v52  ;;  %830 = vadd.xlane.f32.xlu1 %v829_v53  ;;  %v1562_v52 = vld [vmem:[%s3139_s2] sm:$0x3] }
 0x2cb   : > { %1895 = vmatpush.msk.msra.mxu3 %vm1612_vm2, %v1562_v52  ;;  %1859 = vmatpush.msk.msrb.mxu1 %vm1612_vm2, %v1562_v52 }
 0x2ce   : > { %v752_v56 = vpop.f32.mrf.mxu2 }
 0x2cf   : > { %v800_v57 = vmul.f32 %v784_v54, %v752_v56  ;;  %v1185_v58 = vmul.f32 %v1835_v55, %v752_v56 }
 0x2d1   : > { %v1217_v59 = vsel %vm658_vm1, %v1185_v58, 0.0  ;;  %v832_v60 = vsel %vm658_vm1, %v800_v57, 0.0  ;;  %v1193_v57 = vsel %vm658_vm1, %v1177_v51, 0.0 }
 0x2d2   : > { %1218 = vadd.xlane.f32.xlu1 %v1217_v59  ;;  %833 = vadd.xlane.f32.xlu0 %v832_v60 }
 0x2d6   : > { %v755_v63 = vpop.f32.mrf.mxu2 }
 0x2d7   : > { %v801_v0 = vmul.f32 %v785_v61, %v755_v63  ;;  %v1186_v1 = vmul.f32 %v1836_v62, %v755_v63 }
 0x2d9   : > { %v1220_v2 = vsel %vm658_vm1, %v1186_v1, 0.0  ;;  %v835_v3 = vsel %vm658_vm1, %v801_v0, 0.0 }
 0x2da   : > { %1221 = vadd.xlane.f32.xlu0 %v1220_v2  ;;  %836 = vadd.xlane.f32.xlu2 %v835_v3 }
 0x2de   : > { %v758_v6 = vpop.f32.mrf.mxu2 }
 0x2df   : > { %v802_v7 = vmul.f32 %v786_v4, %v758_v6  ;;  %v1187_v8 = vmul.f32 %v1837_v5, %v758_v6 }
 0x2e1   : > { %v1223_v10 = vsel %vm658_vm1, %v1187_v8, 0.0  ;;  %v838_v11 = vsel %vm658_vm1, %v802_v7, 0.0 }
 0x2e2   : > { %1224 = vadd.xlane.f32.xlu2 %v1223_v10  ;;  %839 = vadd.xlane.f32.xlu1 %v838_v11 }
 0x2e6   : > { %v761_v14 = vpop.f32.mrf.mxu2 }
 0x2e7   : > { %v803_v15 = vmul.f32 %v787_v12, %v761_v14  ;;  %v1188_v16 = vmul.f32 %v1838_v13, %v761_v14 }
 0x2e9   : > { %v1226_v18 = vsel %vm658_vm1, %v1188_v16, 0.0  ;;  %v841_v19 = vsel %vm658_vm1, %v803_v15, 0.0 }
 0x2ea   : > { %1227 = vadd.xlane.f32.xlu1 %v1226_v18  ;;  %842 = vadd.xlane.f32.xlu0 %v841_v19 }
 0x2ee   : > { %v764_v23 = vpop.f32.mrf.mxu2 }
 0x2ef   : > { %v804_v24 = vmul.f32 %v788_v20, %v764_v23  ;;  %v1189_v25 = vmul.f32 %v1839_v21, %v764_v23 }
 0x2f1   : > { %v1229_v26 = vsel %vm658_vm1, %v1189_v25, 0.0  ;;  %v844_v27 = vsel %vm658_vm1, %v804_v24, 0.0 }
 0x2f2   : > { %1230 = vadd.xlane.f32.xlu0 %v1229_v26  ;;  %845 = vadd.xlane.f32.xlu2 %v844_v27 }
 0x2f6   : > { %v767_v30 = vpop.f32.mrf.mxu2 }
 0x2f7   : > { %v805_v17 = vmul.f32 %v789_v28, %v767_v30  ;;  %v1190_v31 = vmul.f32 %v1840_v29, %v767_v30 }
 0x2f9   : > { %v1232_v32 = vsel %vm658_vm1, %v1190_v31, 0.0  ;;  %v847_v33 = vsel %vm658_vm1, %v805_v17, 0.0 }
 0x2fa   : > { %1233 = vadd.xlane.f32.xlu2 %v1232_v32  ;;  %848 = vadd.xlane.f32.xlu1 %v847_v33 }
 0x2fe   : > { %v770_v36 = vpop.f32.mrf.mxu2 }
 0x2ff   : > { %v806_v9 = vmul.f32 %v790_v34, %v770_v36  ;;  %v1191_v37 = vmul.f32 %v1841_v35, %v770_v36 }
 0x301   : > { %v1235_v38 = vsel %vm658_vm1, %v1191_v37, 0.0  ;;  %v850_v39 = vsel %vm658_vm1, %v806_v9, 0.0 }
 0x302   : > { %1236 = vadd.xlane.f32.xlu1 %v1235_v38  ;;  %851 = vadd.xlane.f32.xlu0 %v850_v39 }
 0x306   : > { %v773_v44 = vpop.f32.mrf.mxu2 }
 0x307   : > { %v807_v45 = vmul.f32 %v791_v42, %v773_v44  ;;  %v1192_v46 = vmul.f32 %v1842_v43, %v773_v44 }
 0x309   : > { %v1238_v49 = vsel %vm658_vm1, %v1192_v46, 0.0  ;;  %v853_v50 = vsel %vm658_vm1, %v807_v45, 0.0 }
 0x30a   : > { %1239 = vadd.xlane.f32.xlu0 %v1238_v49  ;;  %854 = vadd.xlane.f32.xlu2 %v853_v50 }
 0x30b   : > { %809 = vadd.xlane.f32.xlu1 %v808_v48 }
 0x30d   : > { %v1198_v53 = vpop.xlane.xlu0 %1197  ;;  %v813_v54 = vpop.xlane.xlu2 %812 }
 0x30e   : > { %v1844_v55 = vmul.f32 -1.442695, %v1198_v53  ;;  %v1812_v56 = vmul.f32 -1.442695, %v813_v54 }
 0x310   : > { %1929 = vpow2.f32 %v1844_v55 }
 0x311   : > { %1931 = vpow2.f32 %v1812_v56 }
 0x312   : > { %1194 = vadd.xlane.f32.xlu2 %v1193_v57 }
 0x315   : > { %v1201_v58 = vpop.xlane.xlu2 %1200  ;;  %v816_v59 = vpop.xlane.xlu1 %815 }
 0x316   : > { %v1930_v60 = vpop.eup %1929  ;;  %v1845_v61 = vmul.f32 -1.442695, %v1201_v58  ;;  %v1813_v0 = vmul.f32 -1.442695, %v816_v59 }
 0x317   : > { %v1932_v62 = vpop.eup %1931  ;;  %v1290_v63 = vadd.f32 1.0, %v1930_v60 }
 0x318   : > { %v905_v1 = vadd.f32 1.0, %v1932_v62  ;;  %1933 = vpow2.f32 %v1845_v61 }
 0x319   : > { %1935 = vrcp.f32 %v1290_v63  ;;  %v1329_v10 = vand.u32 2147483647, %v1290_v63  ;;  %v1331_v13 = vand.u32 2147483648, %v1290_v63  ;;  %vm1325_vm6 = vweird.f32 %v1290_v63 }
 0x31a   : > { %1937 = vrcp.f32 %v905_v1  ;;  %v944_v16 = vand.u32 2147483647, %v905_v1  ;;  %v946_v18 = vand.u32 2147483648, %v905_v1  ;;  %vm940_vm5 = vweird.f32 %v905_v1 }
 0x31b   : > { %1939 = vpow2.f32 %v1813_v0  ;;  %vm2539_vm7 = vcmp.eq.f32.partialorder %v1329_v10, 8.507059e+37  ;;  %v1332_v25 = vor.u32 1.1754944e-38, %v1331_v13 }
 0x31c   : > { %vm2544_vm10 = vcmp.eq.f32.partialorder %v944_v16, 8.507059e+37  ;;  %v947_v30 = vor.u32 1.1754944e-38, %v946_v18 }
 0x31d   : > { %v1204_v2 = vpop.xlane.xlu0 %1203  ;;  %v819_v3 = vpop.xlane.xlu2 %818 }
 0x31e   : > { %v1934_v4 = vpop.eup %1933  ;;  %v1846_v5 = vmul.f32 -1.442695, %v1204_v2  ;;  %v1814_v6 = vmul.f32 -1.442695, %v819_v3 }
 0x31f   : > { %v1936_v7 = vpop.eup %1935  ;;  %v2534_v8 = vadd.f32 1.0, %v1934_v4 }
 0x320   : > { %v1938_v11 = vpop.eup %1937  ;;  %1941 = vpow2.f32 %v1846_v5  ;;  %v1321_v12 = vmul.f32 %v1936_v7, %v1290_v63  ;;  %vm1326_vm8 = vweird.f32 %v1936_v7 }
 0x321   : > { %v1940_v14 = vpop.eup %1939  ;;  %1943 = vrcp.f32 %v2534_v8  ;;  %v936_v15 = vmul.f32 %v1938_v11, %v905_v1  ;;  %vm941_vm9 = vweird.f32 %v1938_v11  ;;  %v1344_v34 = vand.u32 2147483647, %v2534_v8  ;;  %vm1327_vm11 = vmor %vm1325_vm6, %vm1326_vm8 }
 0x322   : > { %v2537_v19 = vadd.f32 1.0, %v1940_v14  ;;  %1945 = vpow2.f32 %v1814_v6  ;;  %v1322_v20 = vsub.f32 1.0, %v1321_v12  ;;  %v1346_v38 = vand.u32 2147483648, %v2534_v8  ;;  %vm942_vm12 = vmor %vm940_vm5, %vm941_vm9 }
 0x323   : > { %v937_v21 = vsub.f32 1.0, %v936_v15  ;;  %vm1340_vm13 = vweird.f32 %v2534_v8  ;;  %vm2572_vm0 = vcmp.eq.f32.partialorder %v1344_v34, 8.507059e+37 }
 0x324   : > { %1947 = vrcp.f32 %v2537_v19  ;;  %v1323_v24 = vmul.f32 %v1936_v7, %v1322_v20  ;;  %v959_v37 = vand.u32 2147483647, %v2537_v19  ;;  %v961_v41 = vand.u32 2147483648, %v2537_v19 }
 0x325   : > { %v1207_v26 = vpop.xlane.xlu2 %1206  ;;  %v822_v27 = vpop.xlane.xlu1 %821  ;;  %v938_v28 = vmul.f32 %v1938_v11, %v937_v21  ;;  %vm955_vm14 = vweird.f32 %v2537_v19  ;;  %v1347_v57 = vor.u32 1.1754944e-38, %v1346_v38 }
 0x326   : > { %v1942_v17 = vpop.eup %1941  ;;  %v1847_v31 = vmul.f32 -1.442695, %v1207_v26  ;;  %v1815_v32 = vmul.f32 -1.442695, %v822_v27  ;;  %v1324_v33 = vadd.f32 %v1936_v7, %v1323_v24  ;;  %vm2576_vm1 = vcmp.eq.f32.partialorder %v959_v37, 8.507059e+37 }
 0x327   : > { %v1944_v35 = vpop.eup %1943  ;;  %v2549_v36 = vadd.f32 1.0, %v1942_v17  ;;  %v939_v9 = vadd.f32 %v1938_v11, %v938_v28  ;;  %v962_v56 = vor.u32 1.1754944e-38, %v961_v41 }
 0x328   : > { %v1946_v39 = vpop.eup %1945  ;;  %1949 = vpow2.f32 %v1847_v31  ;;  %v1328_v40 = vsel %vm1327_vm11, %v1936_v7, %v1324_v33  ;;  %v1336_v22 = vmul.f32 %v1944_v35, %v2534_v8  ;;  %vm1341_vm15 = vweird.f32 %v1944_v35 }
 0x329   : > { %1951 = vrcp.f32 %v2549_v36  ;;  %v2560_v42 = vadd.f32 1.0, %v1946_v39  ;;  %v943_v43 = vsel %vm942_vm12, %v1938_v11, %v939_v9  ;;  %v1333_v44 = vsel %vm2539_vm7, %v1332_v25, %v1328_v40  ;;  %vm2586_vm6 = vmor %vm1340_vm13, %vm1341_vm15 }
 0x32a   : > { %v1948_v45 = vpop.eup %1947  ;;  %1953 = vpow2.f32 %v1815_v32  ;;  %v948_v46 = vsel %vm2544_vm10, %v947_v30, %v943_v43  ;;  %v1337_v47 = vsub.f32 1.0, %v1336_v22  ;;  %vm1355_vm2 = vweird.f32 %v2549_v36 }
 0x32b   : > { %1955 = vrcp.f32 %v2560_v42  ;;  %v1547_v48 = vsel %vm1545_vm3, %v948_v46, %v1333_v44  ;;  %v951_v49 = vmul.f32 %v1948_v45, %v2537_v19  ;;  %vm956_vm5 = vweird.f32 %v1948_v45 }
 0x32c   : > { %1861 = vmatmul.msk.f32.vlgmr.msra.gmra.mxu3 %vm1563_vm4, %v1547_v48  ;;  %v1338_v50 = vmul.f32 %v1944_v35, %v1337_v47  ;;  %v974_v2 = vand.u32 2147483647, %v2560_v42  ;;  %vm970_vm7 = vweird.f32 %v2560_v42  ;;  %v976_v5 = vand.u32 2147483648, %v2560_v42  ;;  %vm957_vm8 = vmor %vm955_vm14, %vm956_vm5 }
 0x32d   : > { %v1210_v52 = vpop.xlane.xlu1 %1209  ;;  %v825_v53 = vpop.xlane.xlu0 %824  ;;  %v952_v54 = vsub.f32 1.0, %v951_v49  ;;  %v1359_v11 = vand.u32 2147483647, %v2549_v36  ;;  %v1361_v18 = vand.u32 2147483648, %v2549_v36 }
 0x32e   : > { %v1950_v58 = vpop.eup %1949  ;;  %v1848_v59 = vmul.f32 -1.442695, %v1210_v52  ;;  %v1816_v60 = vmul.f32 -1.442695, %v825_v53  ;;  %v1339_v61 = vadd.f32 %v1944_v35, %v1338_v50  ;;  %vm2607_vm9 = vcmp.eq.f32.partialorder %v974_v2, 8.507059e+37 }
 0x32f   : > { %v1952_v62 = vpop.eup %1951  ;;  %v2581_v63 = vadd.f32 1.0, %v1950_v58  ;;  %v953_v0 = vmul.f32 %v1948_v45, %v952_v54  ;;  %v977_v26 = vor.u32 1.1754944e-38, %v976_v5  ;;  %vm2615_vm12 = vcmp.eq.f32.partialorder %v1359_v11, 8.507059e+37 }
 0x330   : > { %v1954_v3 = vpop.eup %1953  ;;  %1957 = vpow2.f32 %v1848_v59  ;;  %v1343_v4 = vsel %vm2586_vm6, %v1944_v35, %v1339_v61  ;;  %v1351_v6 = vmul.f32 %v1952_v62, %v2549_v36  ;;  %vm1356_vm10 = vweird.f32 %v1952_v62 }
 0x331   : > { %v1956_v7 = vpop.eup %1955  ;;  %1959 = vrcp.f32 %v2581_v63  ;;  %v2597_v8 = vadd.f32 1.0, %v1954_v3  ;;  %v954_v10 = vadd.f32 %v1948_v45, %v953_v0  ;;  %v1348_v12 = vsel %vm2572_vm0, %v1347_v57, %v1343_v4  ;;  %vm1357_vm13 = vmor %vm1355_vm2, %vm1356_vm10 }
 0x332   : > { %1961 = vpow2.f32 %v1816_v60  ;;  %v966_v13 = vmul.f32 %v1956_v7, %v2560_v42  ;;  %v1352_v14 = vsub.f32 1.0, %v1351_v6  ;;  %vm971_vm11 = vweird.f32 %v1956_v7 }
 0x333   : > { %1963 = vrcp.f32 %v2597_v8  ;;  %v958_v15 = vsel %vm957_vm8, %v1948_v45, %v954_v10  ;;  %v1362_v34 = vor.u32 1.1754944e-38, %v1361_v18  ;;  %v989_v35 = vand.u32 2147483647, %v2597_v8  ;;  %vm972_vm14 = vmor %vm970_vm7, %vm971_vm11 }
 0x334   : > { %v963_v20 = vsel %vm2576_vm1, %v962_v56, %v958_v15  ;;  %v967_v19 = vsub.f32 1.0, %v966_v13  ;;  %v1353_v21 = vmul.f32 %v1952_v62, %v1352_v14  ;;  %v991_v9 = vand.u32 2147483648, %v2597_v8 }
 0x335   : > { %v1548_v23 = vsel %vm1545_vm3, %v963_v20, %v1348_v12  ;;  %v1213_v24 = vpop.xlane.xlu0 %1212  ;;  %v828_v25 = vpop.xlane.xlu2 %827  ;;  %v1374_v43 = vand.u32 2147483647, %v2581_v63  ;;  %vm985_vm15 = vweird.f32 %v2597_v8  ;;  %v1376_v42 = vand.u32 2147483648, %v2581_v63 }
 0x336   : > { %v1958_v28 = vpop.eup %1957  ;;  %1862 = vmatmul.msk.f32.gmra.mxu3 %vm1563_vm4, %v1548_v23  ;;  %v1849_v29 = vmul.f32 -1.442695, %v1213_v24  ;;  %v1817_v30 = vmul.f32 -1.442695, %v828_v25  ;;  %v968_v17 = vmul.f32 %v1956_v7, %v967_v19  ;;  %v1354_v31 = vadd.f32 %v1952_v62, %v1353_v21 }
 0x337   : > { %v2620_v32 = vpop.eup %1959  ;;  %v2622_v33 = vadd.f32 1.0, %v1958_v28  ;;  %vm2647_vm0 = vcmp.eq.f32.partialorder %v989_v35, 8.507059e+37  ;;  %vm1370_vm1 = vweird.f32 %v2581_v63  ;;  %v992_v53 = vor.u32 1.1754944e-38, %v991_v9 }
 0x338   : > { %v1962_v37 = vpop.eup %1961  ;;  %1965 = vpow2.f32 %v1849_v29  ;;  %v969_v38 = vadd.f32 %v1956_v7, %v968_v17  ;;  %v1358_v39 = vsel %vm1357_vm13, %v1952_v62, %v1354_v31  ;;  %v1366_v40 = vmul.f32 %v2620_v32, %v2581_v63 }
 0x339   : > { %v1964_v41 = vpop.eup %1963  ;;  %1967 = vrcp.f32 %v2622_v33  ;;  %v2632_v22 = vadd.f32 1.0, %v1962_v37  ;;  %v1363_v36 = vsel %vm2615_vm12, %v1362_v34, %v1358_v39  ;;  %vm1371_vm2 = vweird.f32 %v2620_v32 }
 0x33a   : > { %1969 = vpow2.f32 %v1817_v30  ;;  %v973_v44 = vsel %vm972_vm14, %v1956_v7, %v969_v38  ;;  %v981_v45 = vmul.f32 %v1964_v41, %v2597_v8  ;;  %v1367_v47 = vsub.f32 1.0, %v1366_v40  ;;  %vm1372_vm7 = vmor %vm1370_vm1, %vm1371_vm2 }
 0x33b   : > { %1971 = vrcp.f32 %v2632_v22  ;;  %v978_v46 = vsel %vm2607_vm9, %v977_v26, %v973_v44  ;;  %vm2654_vm5 = vcmp.eq.f32.partialorder %v1374_v43, 8.507059e+37  ;;  %vm986_vm6 = vweird.f32 %v1964_v41 }
 0x33c   : > { %v1549_v48 = vsel %vm1545_vm3, %v978_v46, %v1363_v36  ;;  %v982_v49 = vsub.f32 1.0, %v981_v45  ;;  %v1368_v54 = vmul.f32 %v2620_v32, %v1367_v47  ;;  %v1377_v0 = vor.u32 1.1754944e-38, %v1376_v42  ;;  %vm987_vm9 = vmor %vm985_vm15, %vm986_vm6 }
 0x33d   : > { %v1216_v51 = vpop.xlane.xlu2 %1215  ;;  %v831_v52 = vpop.xlane.xlu1 %830  ;;  %v1004_v1 = vand.u32 2147483647, %v2632_v22  ;;  %vm1000_vm8 = vweird.f32 %v2632_v22  ;;  %v1006_v4 = vand.u32 2147483648, %v2632_v22  ;;  %v1389_v63 = vand.u32 2147483647, %v2622_v33 }
 0x33e   : > { %v1966_v56 = vpop.eup %1965  ;;  %1863 = vmatmul.msk.f32.gmra.mxu3 %vm1563_vm4, %v1549_v48  ;;  %v1850_v57 = vmul.f32 -1.442695, %v1216_v51  ;;  %v1818_v58 = vmul.f32 -1.442695, %v831_v52  ;;  %v983_v59 = vmul.f32 %v1964_v41, %v982_v49  ;;  %v1369_v62 = vadd.f32 %v2620_v32, %v1368_v54 }
 0x33f   : > { %v2659_v60 = vpop.eup %1967  ;;  %v2661_v61 = vadd.f32 1.0, %v1966_v56  ;;  %vm1385_vm10 = vweird.f32 %v2622_v33  ;;  %vm2689_vm11 = vcmp.eq.f32.partialorder %v1004_v1, 8.507059e+37  ;;  %v1391_v20 = vand.u32 2147483648, %v2622_v33 }
 0x340   : > { %v1970_v2 = vpop.eup %1969  ;;  %1973 = vpow2.f32 %v1850_v57  ;;  %v984_v3 = vadd.f32 %v1964_v41, %v983_v59  ;;  %v1381_v5 = vmul.f32 %v2659_v60, %v2622_v33  ;;  %v1373_v10 = vsel %vm1372_vm7, %v2620_v32, %v1369_v62 }
 0x341   : > { %v1972_v6 = vpop.eup %1971  ;;  %1975 = vrcp.f32 %v2661_v61  ;;  %v2674_v7 = vadd.f32 1.0, %v1970_v2  ;;  %v1378_v12 = vsel %vm2654_vm5, %v1377_v0, %v1373_v10  ;;  %v1007_v23 = vor.u32 1.1754944e-38, %v1006_v4 }
 0x342   : > { %1977 = vpow2.f32 %v1818_v58  ;;  %v988_v11 = vsel %vm987_vm9, %v1964_v41, %v984_v3  ;;  %v996_v13 = vmul.f32 %v1972_v6, %v2632_v22  ;;  %v1382_v15 = vsub.f32 1.0, %v1381_v5 }
 0x343   : > { %1979 = vrcp.f32 %v2674_v7  ;;  %v993_v14 = vsel %vm2647_vm0, %v992_v53, %v988_v11  ;;  %vm1386_vm12 = vweird.f32 %v2659_v60  ;;  %vm2696_vm13 = vcmp.eq.f32.partialorder %v1389_v63, 8.507059e+37 }
 0x344   : > { %v1550_v8 = vsel %vm1545_vm3, %v993_v14, %v1378_v12  ;;  %v997_v16 = vsub.f32 1.0, %v996_v13  ;;  %v1383_v24 = vmul.f32 %v2659_v60, %v1382_v15  ;;  %vm1001_vm14 = vweird.f32 %v1972_v6  ;;  %vm1387_vm15 = vmor %vm1385_vm10, %vm1386_vm12 }
 0x345   : > { %v1219_v19 = vpop.xlane.xlu1 %1218  ;;  %v834_v21 = vpop.xlane.xlu0 %833  ;;  %v1019_v32 = vand.u32 2147483647, %v2674_v7  ;;  %v1021_v34 = vand.u32 2147483648, %v2674_v7  ;;  %v1392_v37 = vor.u32 1.1754944e-38, %v1391_v20  ;;  %vm1015_vm0 = vweird.f32 %v2674_v7  ;;  %vm1002_vm1 = vmor %vm1000_vm8, %vm1001_vm14 }
 0x346   : > { %v1974_v26 = vpop.eup %1973  ;;  %1864 = vmatmul.msk.f32.gmra.mxu3 %vm1563_vm4, %v1550_v8  ;;  %v1851_v27 = vmul.f32 -1.442695, %v1219_v19  ;;  %v1819_v28 = vmul.f32 -1.442695, %v834_v21  ;;  %v998_v29 = vmul.f32 %v1972_v6, %v997_v16  ;;  %v1384_v31 = vadd.f32 %v2659_v60, %v1383_v24 }
 0x347   : > { %v2701_v30 = vpop.eup %1975  ;;  %v2703_v17 = vadd.f32 1.0, %v1974_v26  ;;  %v1404_v33 = vand.u32 2147483647, %v2661_v61  ;;  %vm1400_vm2 = vweird.f32 %v2661_v61  ;;  %vm2731_vm5 = vcmp.eq.f32.partialorder %v1019_v32, 8.507059e+37 }
 0x348   : > { %v1978_v35 = vpop.eup %1977  ;;  %1981 = vpow2.f32 %v1851_v27  ;;  %v999_v9 = vadd.f32 %v1972_v6, %v998_v29  ;;  %v1396_v38 = vmul.f32 %v2701_v30, %v2661_v61  ;;  %v1388_v41 = vsel %vm1387_vm15, %v2659_v60, %v1384_v31 }
 0x349   : > { %v1980_v39 = vpop.eup %1979  ;;  %1983 = vrcp.f32 %v2703_v17  ;;  %v2716_v40 = vadd.f32 1.0, %v1978_v35  ;;  %v1393_v43 = vsel %vm2696_vm13, %v1392_v37, %v1388_v41  ;;  %v1406_v48 = vand.u32 2147483648, %v2661_v61 }
 0x34a   : > { %1985 = vpow2.f32 %v1819_v28  ;;  %v1003_v36 = vsel %vm1002_vm1, %v1972_v6, %v999_v9  ;;  %v1011_v44 = vmul.f32 %v1980_v39, %v2674_v7  ;;  %v1397_v46 = vsub.f32 1.0, %v1396_v38 }
 0x34b   : > { %1987 = vrcp.f32 %v2716_v40  ;;  %v1008_v45 = vsel %vm2689_vm11, %v1007_v23, %v1003_v36  ;;  %vm1016_vm6 = vweird.f32 %v1980_v39  ;;  %v1022_v51 = vor.u32 1.1754944e-38, %v1021_v34 }
 0x34c   : > { %v1551_v22 = vsel %vm1545_vm3, %v1008_v45, %v1393_v43  ;;  %v1012_v47 = vsub.f32 1.0, %v1011_v44  ;;  %v1398_v52 = vmul.f32 %v2701_v30, %v1397_v46  ;;  %vm1401_vm7 = vweird.f32 %v2701_v30  ;;  %vm1017_vm10 = vmor %vm1015_vm0, %vm1016_vm6 }
 0x34d   : > { %v1222_v49 = vpop.xlane.xlu0 %1221  ;;  %v837_v50 = vpop.xlane.xlu2 %836  ;;  %vm2739_vm8 = vcmp.eq.f32.partialorder %v1404_v33, 8.507059e+37  ;;  %v1034_v62 = vand.u32 2147483647, %v2716_v40  ;;  %v1036_v0 = vand.u32 2147483648, %v2716_v40  ;;  %vm1402_vm9 = vmor %vm1400_vm2, %vm1401_vm7  ;;  %v1407_v3 = vor.u32 1.1754944e-38, %v1406_v48 }
 0x34e   : > { %v1982_v53 = vpop.eup %1981  ;;  %1865 = vmatmul.msk.f32.gmra.mxu3 %vm1563_vm4, %v1551_v22  ;;  %v1852_v54 = vmul.f32 -1.442695, %v1222_v49  ;;  %v1820_v55 = vmul.f32 -1.442695, %v837_v50  ;;  %v1013_v56 = vmul.f32 %v1980_v39, %v1012_v47  ;;  %v1399_v60 = vadd.f32 %v2701_v30, %v1398_v52 }
 0x34f   : > { %v2743_v58 = vpop.eup %1983  ;;  %v2745_v59 = vadd.f32 1.0, %v1982_v53  ;;  %vm1030_vm11 = vweird.f32 %v2716_v40  ;;  %vm2770_vm12 = vcmp.eq.f32.partialorder %v1034_v62, 8.507059e+37  ;;  %v1037_v8 = vor.u32 1.1754944e-38, %v1036_v0 }
 0x350   : > { %v1986_v1 = vpop.eup %1985  ;;  %1989 = vpow2.f32 %v1852_v54  ;;  %v1014_v2 = vadd.f32 %v1980_v39, %v1013_v56  ;;  %v1411_v4 = vmul.f32 %v2743_v58, %v2703_v17  ;;  %v1403_v10 = vsel %vm1402_vm9, %v2701_v30, %v1399_v60 }
 0x351   : > { %v1988_v5 = vpop.eup %1987  ;;  %1991 = vrcp.f32 %v2745_v59  ;;  %v2757_v6 = vadd.f32 1.0, %v1986_v1  ;;  %v1408_v63 = vsel %vm2739_vm8, %v1407_v3, %v1403_v10  ;;  %v1421_v16 = vand.u32 2147483648, %v2703_v17 }
 0x352   : > { %1993 = vpow2.f32 %v1820_v55  ;;  %v1018_v61 = vsel %vm1017_vm10, %v1980_v39, %v1014_v2  ;;  %v1026_v11 = vmul.f32 %v1988_v5, %v2716_v40  ;;  %v1412_v7 = vsub.f32 1.0, %v1411_v4 }
 0x353   : > { %1995 = vrcp.f32 %v2757_v6  ;;  %v1023_v12 = vsel %vm2731_vm5, %v1022_v51, %v1018_v61  ;;  %vm1415_vm13 = vweird.f32 %v2703_v17  ;;  %vm1416_vm14 = vweird.f32 %v2743_v58 }
 0x354   : > { %v1552_v14 = vsel %vm1545_vm3, %v1023_v12, %v1408_v63  ;;  %v1027_v15 = vsub.f32 1.0, %v1026_v11  ;;  %v1413_v19 = vmul.f32 %v2743_v58, %v1412_v7  ;;  %v1419_v21 = vand.u32 2147483647, %v2703_v17  ;;  %vm1417_vm0 = vmor %vm1415_vm13, %vm1416_vm14 }
 0x355   : > { %v1225_v18 = vpop.xlane.xlu2 %1224  ;;  %v840_v20 = vpop.xlane.xlu1 %839  ;;  %vm1031_vm15 = vweird.f32 %v1988_v5  ;;  %v1049_v30 = vand.u32 2147483647, %v2757_v6  ;;  %v1051_v31 = vand.u32 2147483648, %v2757_v6  ;;  %v1422_v35 = vor.u32 1.1754944e-38, %v1421_v16 }
 0x356   : > { %v1990_v23 = vpop.eup %1989  ;;  %1866 = vmatmul.msk.f32.gmra.mxu3 %vm1563_vm4, %v1552_v14  ;;  %v1853_v24 = vmul.f32 -1.442695, %v1225_v18  ;;  %v1821_v25 = vmul.f32 -1.442695, %v840_v20  ;;  %v1028_v26 = vmul.f32 %v1988_v5, %v1027_v15  ;;  %v1414_v29 = vadd.f32 %v2743_v58, %v1413_v19  ;;  %vm1032_vm2 = vmor %vm1030_vm11, %vm1031_vm15 }
 0x357   : > { %v2781_v27 = vpop.eup %1991  ;;  %v2783_v28 = vadd.f32 1.0, %v1990_v23  ;;  %vm1045_vm1 = vweird.f32 %v2757_v6  ;;  %vm1420_vm5 = vcmp.eq.f32.partialorder %v1419_v21, 8.507059e+37  ;;  %vm2806_vm6 = vcmp.eq.f32.partialorder %v1049_v30, 8.507059e+37 }
 0x358   : > { %v1994_v32 = vpop.eup %1993  ;;  %1997 = vpow2.f32 %v1853_v24  ;;  %v1029_v34 = vadd.f32 %v1988_v5, %v1028_v26  ;;  %v1426_v9 = vmul.f32 %v2781_v27, %v2745_v59  ;;  %v1418_v39 = vsel %vm1417_vm0, %v2743_v58, %v1414_v29 }
 0x359   : > { %v1996_v37 = vpop.eup %1995  ;;  %1999 = vrcp.f32 %v2783_v28  ;;  %v2796_v38 = vadd.f32 1.0, %v1994_v32  ;;  %v1423_v41 = vsel %vm1420_vm5, %v1422_v35, %v1418_v39  ;;  %v1052_v46 = vor.u32 1.1754944e-38, %v1051_v31 }
 0x35a   : > { %2001 = vpow2.f32 %v1821_v25  ;;  %v1033_v17 = vsel %vm1032_vm2, %v1988_v5, %v1029_v34  ;;  %v1041_v33 = vmul.f32 %v1996_v37, %v2757_v6  ;;  %v1427_v44 = vsub.f32 1.0, %v1426_v9 }
 0x35b   : > { %2003 = vrcp.f32 %v2796_v38  ;;  %v1038_v36 = vsel %vm2770_vm12, %v1037_v8, %v1033_v17  ;;  %vm1430_vm7 = vweird.f32 %v2745_v59  ;;  %vm1431_vm8 = vweird.f32 %v2781_v27 }
 0x35c   : > { %v1553_v40 = vsel %vm1545_vm3, %v1038_v36, %v1423_v41  ;;  %v1042_v45 = vsub.f32 1.0, %v1041_v33  ;;  %v1428_v42 = vmul.f32 %v2781_v27, %v1427_v44  ;;  %v1434_v48 = vand.u32 2147483647, %v2745_v59  ;;  %vm1432_vm11 = vmor %vm1430_vm7, %vm1431_vm8 }
 0x35d   : > { %v1228_v22 = vpop.xlane.xlu1 %1227  ;;  %v843_v47 = vpop.xlane.xlu0 %842  ;;  %v1436_v49 = vand.u32 2147483648, %v2745_v59  ;;  %vm1046_vm9 = vweird.f32 %v1996_v37  ;;  %vm1060_vm10 = vweird.f32 %v2796_v38  ;;  %v1064_v57 = vand.u32 2147483647, %v2796_v38 }
 0x35e   : > { %v1998_v50 = vpop.eup %1997  ;;  %1867 = vmatmul.msk.f32.gmra.mxu3 %vm1563_vm4, %v1553_v40  ;;  %v1854_v51 = vmul.f32 -1.442695, %v1228_v22  ;;  %v1822_v52 = vmul.f32 -1.442695, %v843_v47  ;;  %v1043_v53 = vmul.f32 %v1996_v37, %v1042_v45  ;;  %v1429_v56 = vadd.f32 %v2781_v27, %v1428_v42  ;;  %vm1047_vm12 = vmor %vm1045_vm1, %vm1046_vm9 }
 0x35f   : > { %v2817_v54 = vpop.eup %1999  ;;  %v2819_v55 = vadd.f32 1.0, %v1998_v50  ;;  %v1437_v62 = vor.u32 1.1754944e-38, %v1436_v49  ;;  %vm1435_vm13 = vcmp.eq.f32.partialorder %v1434_v48, 8.507059e+37  ;;  %vm2841_vm14 = vcmp.eq.f32.partialorder %v1064_v57, 8.507059e+37 }
 0x360   : > { %v2002_v58 = vpop.eup %2001  ;;  %2005 = vpow2.f32 %v1854_v51  ;;  %v1044_v60 = vadd.f32 %v1996_v37, %v1043_v53  ;;  %v1441_v0 = vmul.f32 %v2817_v54, %v2783_v28  ;;  %v1433_v3 = vsel %vm1432_vm11, %v2781_v27, %v1429_v56 }
 0x361   : > { %v2004_v1 = vpop.eup %2003  ;;  %2007 = vrcp.f32 %v2819_v55  ;;  %v2831_v2 = vadd.f32 1.0, %v2002_v58  ;;  %v1438_v59 = vsel %vm1435_vm13, %v1437_v62, %v1433_v3  ;;  %v1066_v6 = vand.u32 2147483648, %v2796_v38 }
 0x362   : > { %2009 = vpow2.f32 %v1822_v52  ;;  %v1048_v4 = vsel %vm1047_vm12, %v1996_v37, %v1044_v60  ;;  %v1056_v5 = vmul.f32 %v2004_v1, %v2796_v38  ;;  %vm1061_vm15 = vweird.f32 %v2004_v1 }
 0x363   : > { %2011 = vrcp.f32 %v2831_v2  ;;  %v1053_v10 = vsel %vm2806_vm6, %v1052_v46, %v1048_v4  ;;  %v1442_v12 = vsub.f32 1.0, %v1441_v0  ;;  %vm1446_vm0 = vweird.f32 %v2817_v54  ;;  %vm2862_vm5 = vmor %vm1060_vm10, %vm1061_vm15 }
 0x364   : > { %v1554_v63 = vsel %vm1545_vm3, %v1053_v10, %v1438_v59  ;;  %v1057_v11 = vsub.f32 1.0, %v1056_v5  ;;  %v1449_v14 = vand.u32 2147483647, %v2783_v28  ;;  %v1451_v15 = vand.u32 2147483648, %v2783_v28 }
 0x365   : > { %v1231_v13 = vpop.xlane.xlu0 %1230  ;;  %v846_v7 = vpop.xlane.xlu2 %845  ;;  %v1079_v8 = vand.u32 2147483647, %v2831_v2  ;;  %v1443_v21 = vmul.f32 %v2817_v54, %v1442_v12  ;;  %v1067_v25 = vor.u32 1.1754944e-38, %v1066_v6  ;;  %vm1445_vm1 = vweird.f32 %v2783_v28 }
 0x366   : > { %v2006_v16 = vpop.eup %2005  ;;  %1868 = vmatmul.msk.f32.gmra.mxu3 %vm1563_vm4, %v1554_v63  ;;  %v1855_v18 = vmul.f32 -1.442695, %v1231_v13  ;;  %v1823_v20 = vmul.f32 -1.442695, %v846_v7  ;;  %v1058_v19 = vmul.f32 %v2004_v1, %v1057_v11  ;;  %vm1075_vm2 = vweird.f32 %v2831_v2  ;;  %vm1447_vm7 = vmor %vm1445_vm1, %vm1446_vm0 }
 0x367   : > { %v2853_v23 = vpop.eup %2007  ;;  %v2855_v24 = vadd.f32 1.0, %v2006_v16  ;;  %v1444_v30 = vadd.f32 %v2817_v54, %v1443_v21  ;;  %vm1450_vm6 = vcmp.eq.f32.partialorder %v1449_v14, 8.507059e+37  ;;  %v1452_v28 = vor.u32 1.1754944e-38, %v1451_v15 }
 0x368   : > { %v2010_v26 = vpop.eup %2009  ;;  %2013 = vpow2.f32 %v1855_v18  ;;  %v1059_v27 = vadd.f32 %v2004_v1, %v1058_v19  ;;  %v1456_v34 = vmul.f32 %v2853_v23, %v2819_v55  ;;  %vm2878_vm8 = vcmp.eq.f32.partialorder %v1079_v8, 8.507059e+37 }
 0x369   : > { %v2012_v31 = vpop.eup %2011  ;;  %2015 = vrcp.f32 %v2855_v24  ;;  %v2868_v32 = vadd.f32 1.0, %v2010_v26  ;;  %v1448_v9 = vsel %vm1447_vm7, %v2817_v54, %v1444_v30  ;;  %v1081_v41 = vand.u32 2147483648, %v2831_v2 }
 0x36a   : > { %2017 = vpow2.f32 %v1823_v20  ;;  %v1063_v35 = vsel %vm2862_vm5, %v2004_v1, %v1059_v27  ;;  %v1071_v37 = vmul.f32 %v2012_v31, %v2831_v2  ;;  %v1453_v17 = vsel %vm1450_vm6, %v1452_v28, %v1448_v9 }
 0x36b   : > { %2019 = vrcp.f32 %v2868_v32  ;;  %v1068_v39 = vsel %vm2841_vm14, %v1067_v25, %v1063_v35  ;;  %v1457_v43 = vsub.f32 1.0, %v1456_v34  ;;  %vm1460_vm9 = vweird.f32 %v2819_v55 }
 0x36c   : > { %v1555_v33 = vsel %vm1545_vm3, %v1068_v39, %v1453_v17  ;;  %v1072_v36 = vsub.f32 1.0, %v1071_v37  ;;  %vm1076_vm10 = vweird.f32 %v2012_v31  ;;  %vm1461_vm11 = vweird.f32 %v2853_v23 }
 0x36d   : > { %v1234_v44 = vpop.xlane.xlu2 %1233  ;;  %v849_v40 = vpop.xlane.xlu1 %848  ;;  %v1464_v45 = vand.u32 2147483647, %v2819_v55  ;;  %v1466_v46 = vand.u32 2147483648, %v2819_v55  ;;  %v1458_v49 = vmul.f32 %v2853_v23, %v1457_v43  ;;  %v1082_v52 = vor.u32 1.1754944e-38, %v1081_v41  ;;  %vm1077_vm14 = vmor %vm1075_vm2, %vm1076_vm10 }
 0x36e   : > { %v2014_v22 = vpop.eup %2013  ;;  %1869 = vmatmul.msk.f32.gmra.mxu3 %vm1563_vm4, %v1555_v33  ;;  %v1856_v47 = vmul.f32 -1.442695, %v1234_v44  ;;  %v1824_v42 = vmul.f32 -1.442695, %v849_v40  ;;  %v1073_v48 = vmul.f32 %v2012_v31, %v1072_v36  ;;  %vm1090_vm13 = vweird.f32 %v2868_v32  ;;  %vm1462_vm15 = vmor %vm1460_vm9, %vm1461_vm11 }
 0x36f   : > { %v2893_v50 = vpop.eup %2015  ;;  %v2895_v51 = vadd.f32 1.0, %v2014_v22  ;;  %vm2897_vm12 = vcmp.eq.f32.partialorder %v1464_v45, 8.507059e+37  ;;  %v1459_v57 = vadd.f32 %v2853_v23, %v1458_v49  ;;  %v1094_v58 = vand.u32 2147483647, %v2868_v32 }
 0x370   : > { %v2018_v54 = vpop.eup %2017  ;;  %2021 = vpow2.f32 %v1856_v47  ;;  %v1074_v56 = vadd.f32 %v2012_v31, %v1073_v48  ;;  %v1467_v0 = vor.u32 1.1754944e-38, %v1466_v46  ;;  %v1471_v1 = vmul.f32 %v2893_v50, %v2855_v24 }
 0x371   : > { %v2020_v60 = vpop.eup %2019  ;;  %2023 = vrcp.f32 %v2895_v51  ;;  %v2908_v62 = vadd.f32 1.0, %v2018_v54  ;;  %v1463_v3 = vsel %vm1462_vm15, %v2853_v23, %v1459_v57  ;;  %v1096_v55 = vand.u32 2147483648, %v2868_v32 }
 0x372   : > { %2025 = vpow2.f32 %v1824_v42  ;;  %v1078_v2 = vsel %vm1077_vm14, %v2012_v31, %v1074_v56  ;;  %v1086_v4 = vmul.f32 %v2020_v60, %v2868_v32  ;;  %v1468_v5 = vsel %vm2897_vm12, %v1467_v0, %v1463_v3 }
 0x373   : > { %2027 = vrcp.f32 %v2908_v62  ;;  %v1083_v59 = vsel %vm2878_vm8, %v1082_v52, %v1078_v2  ;;  %vm2925_vm0 = vcmp.eq.f32.partialorder %v1094_v58, 8.507059e+37  ;;  %v1472_v63 = vsub.f32 1.0, %v1471_v1 }
 0x374   : > { %v1556_v10 = vsel %vm1545_vm3, %v1083_v59, %v1468_v5  ;;  %v1087_v61 = vsub.f32 1.0, %v1086_v4  ;;  %vm1091_vm1 = vweird.f32 %v2020_v60  ;;  %vm1476_vm2 = vweird.f32 %v2893_v50 }
 0x375   : > { %v1237_v11 = vpop.xlane.xlu1 %1236  ;;  %v852_v12 = vpop.xlane.xlu0 %851  ;;  %v1479_v13 = vand.u32 2147483647, %v2855_v24  ;;  %v1481_v7 = vand.u32 2147483648, %v2855_v24  ;;  %v1473_v18 = vmul.f32 %v2893_v50, %v1472_v63  ;;  %v1097_v21 = vor.u32 1.1754944e-38, %v1096_v55  ;;  %vm1092_vm7 = vmor %vm1090_vm13, %vm1091_vm1 }
 0x376   : > { %v2022_v14 = vpop.eup %2021  ;;  %1870 = vmatmul.msk.f32.gmra.mxu3 %vm1563_vm4, %v1556_v10  ;;  %v1857_v15 = vmul.f32 -1.442695, %v1237_v11  ;;  %v1825_v8 = vmul.f32 -1.442695, %v852_v12  ;;  %v1088_v16 = vmul.f32 %v2020_v60, %v1087_v61  ;;  %vm1475_vm5 = vweird.f32 %v2855_v24 }
 0x377   : > { %v2934_v20 = vpop.eup %2023  ;;  %v2936_v19 = vadd.f32 1.0, %v2022_v14  ;;  %vm2939_vm6 = vcmp.eq.f32.partialorder %v1479_v13, 8.507059e+37  ;;  %v1474_v27 = vadd.f32 %v2893_v50, %v1473_v18  ;;  %v1482_v29 = vor.u32 1.1754944e-38, %v1481_v7  ;;  %vm1477_vm8 = vmor %vm1475_vm5, %vm1476_vm2 }
 0x378   : > { %v2026_v25 = vpop.eup %2025  ;;  %2029 = vpow2.f32 %v1857_v15  ;;  %v1089_v26 = vadd.f32 %v2020_v60, %v1088_v16  ;;  %v1109_v24 = vand.u32 2147483647, %v2908_v62  ;;  %v1111_v28 = vand.u32 2147483648, %v2908_v62 }
 0x379   : > { %v2028_v30 = vpop.eup %2027  ;;  %v2947_v31 = vadd.f32 1.0, %v2026_v25  ;;  %v1486_v34 = vmul.f32 %v2934_v20, %v2895_v51  ;;  %2031 = vpow2.f32 %v1825_v8  ;;  %v1478_v32 = vsel %vm1477_vm8, %v2893_v50, %v1474_v27 }
 0x37a   : > { %v1093_v35 = vsel %vm1092_vm7, %v2020_v60, %v1089_v26  ;;  %v1101_v9 = vmul.f32 %v2028_v30, %v2908_v62  ;;  %v1483_v38 = vsel %vm2939_vm6, %v1482_v29, %v1478_v32  ;;  %vm1105_vm9 = vweird.f32 %v2908_v62 }
 0x37b   : > { %2033 = vrcp.f32 %v2947_v31  ;;  %v1098_v37 = vsel %vm2925_vm0, %v1097_v21, %v1093_v35  ;;  %vm1106_vm10 = vweird.f32 %v2028_v30  ;;  %vm2965_vm11 = vcmp.eq.f32.partialorder %v1109_v24, 8.507059e+37 }
 0x37c   : > { %2035 = vrcp.f32 %v2936_v19  ;;  %v1557_v39 = vsel %vm1545_vm3, %v1098_v37, %v1483_v38  ;;  %v1102_v17 = vsub.f32 1.0, %v1101_v9  ;;  %v1112_v43 = vor.u32 1.1754944e-38, %v1111_v28  ;;  %vm1107_vm14 = vmor %vm1105_vm9, %vm1106_vm10 }
 0x37d   : > { %v1240_v41 = vpop.xlane.xlu0 %1239  ;;  %v855_v33 = vpop.xlane.xlu2 %854  ;;  %v1487_v44 = vsub.f32 1.0, %v1486_v34  ;;  %v1496_v42 = vand.u32 2147483648, %v2895_v51  ;;  %vm1491_vm12 = vweird.f32 %v2934_v20  ;;  %v1494_v50 = vand.u32 2147483647, %v2895_v51 }
 0x37e   : > { %v2030_v40 = vpop.eup %2029  ;;  %1871 = vmatmul.msk.f32.gmra.mxu3 %vm1563_vm4, %v1557_v39  ;;  %v1858_v45 = vmul.f32 -1.442695, %v1240_v41  ;;  %v1826_v46 = vmul.f32 -1.442695, %v855_v33  ;;  %v810_v22 = vpop.xlane.xlu1 %809  ;;  %v1103_v47 = vmul.f32 %v2028_v30, %v1102_v17  ;;  %vm1490_vm13 = vweird.f32 %v2895_v51 }
 0x37f   : > { %v2971_v48 = vadd.f32 1.0, %v2030_v40  ;;  %v1488_v49 = vmul.f32 %v2934_v20, %v1487_v44  ;;  %v2032_v52 = vpop.eup %2031  ;;  %v1811_v53 = vmul.f32 -1.442695, %v810_v22  ;;  %v1497_v60 = vor.u32 1.1754944e-38, %v1496_v42  ;;  %vm1492_vm15 = vmor %vm1490_vm13, %vm1491_vm12 }
 0x380   : > { %2037 = vpow2.f32 %v1858_v45  ;;  %v1104_v54 = vadd.f32 %v2028_v30, %v1103_v47  ;;  %v2978_v57 = vadd.f32 1.0, %v2032_v52  ;;  %v1124_v2 = vand.u32 2147483647, %v2947_v31 }
 0x381   : > { %v2034_v56 = vpop.eup %2033  ;;  %2039 = vrcp.f32 %v2971_v48  ;;  %v1489_v58 = vadd.f32 %v2934_v20, %v1488_v49  ;;  %vm1495_vm0 = vcmp.eq.f32.partialorder %v1494_v50, 8.507059e+37  ;;  %v1126_v5 = vand.u32 2147483648, %v2947_v31  ;;  %v2062_v50 = vld [vmem:[%s2184_s15 + $0x30] sm:$0xff] }
 0x382   : > { %v2036_v0 = vpop.eup %2035  ;;  %2041 = vpow2.f32 %v1826_v46  ;;  %v1108_v1 = vsel %vm1107_vm14, %v2028_v30, %v1104_v54  ;;  %v1116_v51 = vmul.f32 %v2034_v56, %v2947_v31  ;;  %vm1120_vm1 = vweird.f32 %v2947_v31 }
 0x383   : > { %2043 = vrcp.f32 %v2978_v57  ;;  %v1113_v3 = vsel %vm2965_vm11, %v1112_v43, %v1108_v1  ;;  %v1493_v62 = vsel %vm1492_vm15, %v2934_v20, %v1489_v58  ;;  %vm1121_vm2 = vweird.f32 %v2034_v56 }
 0x384   : > { %2045 = vpow2.f32 %v1811_v53  ;;  %v1498_v4 = vsel %vm1495_vm0, %v1497_v60, %v1493_v62  ;;  %v1117_v59 = vsub.f32 1.0, %v1116_v51  ;;  %v1501_v61 = vmul.f32 %v2036_v0, %v2936_v19  ;;  %vm1122_vm8 = vmor %vm1120_vm1, %vm1121_vm2 }
 0x385   : > { %v1558_v55 = vsel %vm1545_vm3, %v1113_v3, %v1498_v4  ;;  %v1195_v10 = vpop.xlane.xlu2 %1194  ;;  %vm2997_vm5 = vcmp.eq.f32.partialorder %v1124_v2, 8.507059e+37  ;;  %v1509_v13 = vand.u32 2147483647, %v2936_v19  ;;  %vm1505_vm6 = vweird.f32 %v2936_v19 }
 0x386   : > { %v2038_v6 = vpop.eup %2037  ;;  %1872 = vmatmul.msk.f32.gmra.mxu3 %vm1563_vm4, %v1558_v55  ;;  %v1843_v63 = vmul.f32 -1.442695, %v1195_v10  ;;  %v1118_v11 = vmul.f32 %v2034_v56, %v1117_v59  ;;  %v1502_v15 = vsub.f32 1.0, %v1501_v61  ;;  %v1511_v8 = vand.u32 2147483648, %v2936_v19 }
 0x387   : > { %v3002_v7 = vpop.eup %2039  ;;  %v3004_v14 = vadd.f32 1.0, %v2038_v6  ;;  %v1127_v20 = vor.u32 1.1754944e-38, %v1126_v5  ;;  %vm1506_vm7 = vweird.f32 %v2036_v0  ;;  %vm1135_vm9 = vweird.f32 %v2978_v57  ;;  %v2069_v6 = vld [vmem:[%s2184_s15 + $0x68] sm:$0xff] }
 0x388   : > { %v2042_v16 = vpop.eup %2041  ;;  %2047 = vpow2.f32 %v1843_v63  ;;  %v1119_v18 = vadd.f32 %v2034_v56, %v1118_v11  ;;  %v1503_v25 = vmul.f32 %v2036_v0, %v1502_v15  ;;  %vm3015_vm10 = vcmp.eq.f32.partialorder %v1509_v13, 8.507059e+37  ;;  %vm1507_vm11 = vmor %vm1505_vm6, %vm1506_vm7 }
 0x389   : > { %v2044_v21 = vpop.eup %2043  ;;  %2049 = vrcp.f32 %v3004_v14  ;;  %v3009_v23 = vadd.f32 1.0, %v2042_v16  ;;  %v1139_v24 = vand.u32 2147483647, %v2978_v57  ;;  %v1512_v31 = vor.u32 1.1754944e-38, %v1511_v8 }
 0x38a   : > { %v2046_v26 = vpop.eup %2045  ;;  %v1123_v27 = vsel %vm1122_vm8, %v2034_v56, %v1119_v18  ;;  %v1131_v30 = vmul.f32 %v2044_v21, %v2978_v57  ;;  %v1504_v34 = vadd.f32 %v2036_v0, %v1503_v25  ;;  %vm1136_vm12 = vweird.f32 %v2044_v21 }
 0x38b   : > { %2051 = vrcp.f32 %v3009_v23  ;;  %v3022_v28 = vadd.f32 1.0, %v2046_v26  ;;  %v1128_v35 = vsel %vm2997_vm5, %v1127_v20, %v1123_v27  ;;  %v1516_v9 = vmul.f32 %v3002_v7, %v2971_v48  ;;  %vm1137_vm0 = vmor %vm1135_vm9, %vm1136_vm12 }
 0x38c   : > { %v1132_v32 = vsub.f32 1.0, %v1131_v30  ;;  %v1508_v37 = vsel %vm1507_vm11, %v2036_v0, %v1504_v34  ;;  %v1141_v38 = vand.u32 2147483648, %v2978_v57  ;;  %v1524_v39 = vand.u32 2147483647, %v2971_v48 }
 0x38d   : > { %2053 = vrcp.f32 %v3022_v28  ;;  %v1513_v41 = vsel %vm3015_vm10, %v1512_v31, %v1508_v37  ;;  %vm3036_vm13 = vcmp.eq.f32.partialorder %v1139_v24, 8.507059e+37  ;;  %v1517_v36 = vsub.f32 1.0, %v1516_v9 }
 0x38e   : > { %v2048_v17 = vpop.eup %2047  ;;  %v1133_v33 = vmul.f32 %v2044_v21, %v1132_v32  ;;  %v1559_v40 = vsel %vm1545_vm3, %v1128_v35, %v1513_v41  ;;  %vm1520_vm14 = vweird.f32 %v2971_v48  ;;  %v1526_v45 = vand.u32 2147483648, %v2971_v48 }
 0x38f   : > { %v2050_v43 = vpop.eup %2049  ;;  %v3040_v44 = vadd.f32 1.0, %v2048_v17  ;;  %1873 = vmatmul.msk.f32.gmra.mxu3 %vm1563_vm4, %v1559_v40  ;;  %v1518_v47 = vmul.f32 %v3002_v7, %v1517_v36  ;;  %vm1521_vm15 = vweird.f32 %v3002_v7  ;;  %v1142_v49 = vor.u32 1.1754944e-38, %v1141_v38 }
 0x390   : > { %v1531_v46 = vmul.f32 %v2050_v43, %v3004_v14  ;;  %v1134_v22 = vadd.f32 %v2044_v21, %v1133_v33  ;;  %vm3053_vm1 = vcmp.eq.f32.partialorder %v1524_v39, 8.507059e+37  ;;  %vm1150_vm2 = vweird.f32 %v3009_v23  ;;  %vm1522_vm5 = vmor %vm1520_vm14, %vm1521_vm15  ;;  %v2057_v39 = vld [vmem:[%s2184_s15 + $0x8] sm:$0xff]  ;;  %v2058_v33 = vld [vmem:[%s2184_s15 + $0x10] sm:$0xff] }
 0x391   : > { %v2052_v42 = vpop.eup %2051  ;;  %2055 = vrcp.f32 %v3040_v44  ;;  %v1519_v53 = vadd.f32 %v3002_v7, %v1518_v47  ;;  %v1527_v54 = vor.u32 1.1754944e-38, %v1526_v45  ;;  %v1154_v57 = vand.u32 2147483647, %v3009_v23  ;;  %v2060_v45 = vld [vmem:[%s2184_s15 + $0x20] sm:$0xff]  ;;  %v2061_v47 = vld [vmem:[%s2184_s15 + $0x28] sm:$0xff] }
 0x392   : > { %v1138_v52 = vsel %vm1137_vm0, %v2044_v21, %v1134_v22  ;;  %v1146_v56 = vmul.f32 %v2052_v42, %v3009_v23  ;;  %v1156_v0 = vand.u32 2147483648, %v3009_v23  ;;  %v1532_v1 = vsub.f32 1.0, %v1531_v46 }
 0x393   : > { %v2054_v58 = vpop.eup %2053  ;;  %v1143_v60 = vsel %vm3036_vm13, %v1142_v49, %v1138_v52  ;;  %v1523_v2 = vsel %vm1522_vm5, %v3002_v7, %v1519_v53  ;;  %vm1151_vm6 = vweird.f32 %v2052_v42  ;;  %vm1536_vm7 = vweird.f32 %v2050_v43 }
 0x394   : > { %v921_v51 = vmul.f32 %v2054_v58, %v3022_v28  ;;  %v1147_v3 = vsub.f32 1.0, %v1146_v56  ;;  %v1528_v62 = vsel %vm3053_vm1, %v1527_v54, %v1523_v2  ;;  %v1533_v4 = vmul.f32 %v2050_v43, %v1532_v1  ;;  %vm1152_vm11 = vmor %vm1150_vm2, %vm1151_vm6  ;;  %v2063_v54 = vld [vmem:[%s2184_s15 + $0x38] sm:$0xff]  ;;  %v2065_v1 = vld [vmem:[%s2184_s15 + $0x48] sm:$0xff] }
 0x395   : > { %v1539_v59 = vand.u32 2147483647, %v3004_v14  ;;  %v1560_v5 = vsel %vm1545_vm3, %v1143_v60, %v1528_v62  ;;  %v1541_v10 = vand.u32 2147483648, %v3004_v14  ;;  %vm3073_vm8 = vcmp.eq.f32.partialorder %v1154_v57, 8.507059e+37  ;;  %v2064_v60 = vld [vmem:[%s2184_s15 + $0x40] sm:$0xff] }
 0x396   : > { %v922_v48 = vsub.f32 1.0, %v921_v51  ;;  %v1148_v55 = vmul.f32 %v2052_v42, %v1147_v3  ;;  %v1157_v63 = vor.u32 1.1754944e-38, %v1156_v0  ;;  %v1534_v11 = vadd.f32 %v2050_v43, %v1533_v4  ;;  %v2066_v3 = vld [vmem:[%s2184_s15 + $0x50] sm:$0xff] }
 0x397   : > { %v2056_v61 = vpop.eup %2055  ;;  %vm1535_vm9 = vweird.f32 %v3004_v14  ;;  %1874 = vmatmul.msk.f32.gmra.mxu3 %vm1563_vm4, %v1560_v5  ;;  %v1542_v7 = vor.u32 1.1754944e-38, %v1541_v10  ;;  %vm1540_vm12 = vcmp.eq.f32.partialorder %v1539_v59, 8.507059e+37  ;;  %vm925_vm13 = vweird.f32 %v3022_v28  ;;  %v2067_v59 = vld [vmem:[%s2184_s15 + $0x58] sm:$0xff] }
 0x398   : > { %v1306_v12 = vmul.f32 %v2056_v61, %v3040_v44  ;;  %v1149_v13 = vadd.f32 %v2052_v42, %v1148_v55  ;;  %vm1537_vm10 = vmor %vm1535_vm9, %vm1536_vm7  ;;  %v923_v15 = vmul.f32 %v2054_v58, %v922_v48  ;;  %vm926_vm14 = vweird.f32 %v2054_v58  ;;  %v2068_v55 = vld [vmem:[%s2184_s15 + $0x60] sm:$0xff] }
 0x399   : > { %v1538_v8 = vsel %vm1537_vm10, %v2050_v43, %v1534_v11  ;;  %v931_v25 = vand.u32 2147483648, %v3022_v28  ;;  %v929_v26 = vand.u32 2147483647, %v3022_v28  ;;  %vm1311_vm15 = vweird.f32 %v2056_v61  ;;  %vm927_vm0 = vmor %vm925_vm13, %vm926_vm14  ;;  %v2059_v43 = vld [vmem:[%s2184_s15 + $0x18] sm:$0xff] }
 0x39a   : > { %v1307_v16 = vsub.f32 1.0, %v1306_v12  ;;  %v1153_v18 = vsel %vm1152_vm11, %v2052_v42, %v1149_v13  ;;  %v1543_v14 = vsel %vm1540_vm12, %v1542_v7, %v1538_v8  ;;  %v924_v20 = vadd.f32 %v2054_v58, %v923_v15  ;;  %v2070_v12 = vld [vmem:[%s2184_s15 + $0x70] sm:$0xff]  ;;  %v2071_v15 = vld [vmem:[%s2184_s15] sm:$0xff] }
 0x39b   : > { %v1158_v21 = vsel %vm3073_vm8, %v1157_v63, %v1153_v18  ;;  %v1314_v23 = vand.u32 2147483647, %v3040_v44  ;;  %v1316_v30 = vand.u32 2147483648, %v3040_v44  ;;  %vm1310_vm1 = vweird.f32 %v3040_v44  ;;  %v2072_v18 = vld [vmem:[%s2184_s15 + $0x78] sm:$0xff] }
 0x39c   : > { %v1308_v27 = vmul.f32 %v2056_v61, %v1307_v16  ;;  %v1561_v29 = vsel %vm1545_vm3, %v1158_v21, %v1543_v14  ;;  %v928_v24 = vsel %vm927_vm0, %v2054_v58, %v924_v20  ;;  %v932_v31 = vor.u32 1.1754944e-38, %v931_v25  ;;  %vm1312_vm2 = vmor %vm1310_vm1, %vm1311_vm15 }
 0x39d   : > { %v1317_v35 = vor.u32 1.1754944e-38, %v1316_v30  ;;  %vm930_vm5 = vcmp.eq.f32.partialorder %v929_v26, 8.507059e+37  ;;  %vm1315_vm6 = vcmp.eq.f32.partialorder %v1314_v23, 8.507059e+37 }
 0x39e   : > { %v1309_v34 = vadd.f32 %v2056_v61, %v1308_v27  ;;  %v933_v32 = vsel %vm930_vm5, %v932_v31, %v928_v24 }
 0x39f   : > { %1875 = vmatmul.msk.f32.gmra.mxu3 %vm1563_vm4, %v1561_v29 }
 0x3a0   : > { %v1313_v28 = vsel %vm1312_vm2, %v2056_v61, %v1309_v34 }
 0x3a1   : > { %v1318_v9 = vsel %vm1315_vm6, %v1317_v35, %v1313_v28 }
 0x3a2   : > { %v1546_v37 = vsel %vm1545_vm3, %v933_v32, %v1318_v9 }
 0x3a3   : > { %1860 = vmatmul.msk.f32.vlgmr.msrb.gmra.mxu1 %vm1563_vm4, %v1546_v37 }
 0x3af   : > { %v1636_v38 = vpop.f32.mrf.mxu3 }
 0x3b0   : > { %v1682_v17 = vmul.f32 %v2057_v39, %v1636_v38 }
 0x3b2   : > { %1698 = vst [vmem:[%s3100_s12 + $0x8] sm:$0xff] %v1682_v17 }
 0x3b9   : > { %v1639_v41 = vpop.f32.mrf.mxu3 }
 0x3ba   : > { %v1683_v19 = vmul.f32 %v2058_v33, %v1639_v41 }
 0x3bc   : > { %1699 = vst [vmem:[%s3100_s12 + $0x10] sm:$0xff] %v1683_v19 }
 0x3c1   : > { %v1642_v36 = vpop.f32.mrf.mxu3 }
 0x3c2   : > { %v1684_v44 = vmul.f32 %v2059_v43, %v1642_v36 }
 0x3c4   : > { %1700 = vst [vmem:[%s3100_s12 + $0x18] sm:$0xff] %v1684_v44 }
 0x3c9   : > { %v1645_v40 = vpop.f32.mrf.mxu3 }
 0x3ca   : > { %v1685_v46 = vmul.f32 %v2060_v45, %v1645_v40 }
 0x3cc   : > { %1701 = vst [vmem:[%s3100_s12 + $0x20] sm:$0xff] %v1685_v46 }
 0x3d1   : > { %v1648_v22 = vpop.f32.mrf.mxu3 }
 0x3d2   : > { %v1686_v42 = vmul.f32 %v2061_v47, %v1648_v22 }
 0x3d4   : > { %1702 = vst [vmem:[%s3100_s12 + $0x28] sm:$0xff] %v1686_v42 }
 0x3d9   : > { %v1651_v49 = vpop.f32.mrf.mxu3 }
 0x3da   : > { %v1687_v52 = vmul.f32 %v2062_v50, %v1651_v49 }
 0x3dc   : > { %1703 = vst [vmem:[%s3100_s12 + $0x30] sm:$0xff] %v1687_v52 }
 0x3e1   : > { %v1654_v53 = vpop.f32.mrf.mxu3 }
 0x3e2   : > { %v1688_v56 = vmul.f32 %v2063_v54, %v1654_v53 }
 0x3e4   : > { %1704 = vst [vmem:[%s3100_s12 + $0x38] sm:$0xff] %v1688_v56 }
 0x3e9   : > { %v1657_v58 = vpop.f32.mrf.mxu3 }
 0x3ea   : > { %v1689_v57 = vmul.f32 %v2064_v60, %v1657_v58 }
 0x3ec   : > { %1705 = vst [vmem:[%s3100_s12 + $0x40] sm:$0xff] %v1689_v57 }
 0x3f1   : > { %v1660_v0 = vpop.f32.mrf.mxu3 }
 0x3f2   : > { %v1690_v51 = vmul.f32 %v2065_v1, %v1660_v0 }
 0x3f4   : > { %1706 = vst [vmem:[%s3100_s12 + $0x48] sm:$0xff] %v1690_v51 }
 0x3f9   : > { %v1663_v2 = vpop.f32.mrf.mxu3 }
 0x3fa   : > { %v1691_v62 = vmul.f32 %v2066_v3, %v1663_v2 }
 0x3fc   : > { %1707 = vst [vmem:[%s3100_s12 + $0x50] sm:$0xff] %v1691_v62 }
 0x401   : > { %v1666_v4 = vpop.f32.mrf.mxu3 }
 0x402   : > { %v1692_v48 = vmul.f32 %v2067_v59, %v1666_v4 }
 0x404   : > { %1708 = vst [vmem:[%s3100_s12 + $0x58] sm:$0xff] %v1692_v48 }
 0x409   : > { %v1669_v5 = vpop.f32.mrf.mxu3 }
 0x40a   : > { %v1693_v10 = vmul.f32 %v2068_v55, %v1669_v5 }
 0x40c   : > { %1709 = vst [vmem:[%s3100_s12 + $0x60] sm:$0xff] %v1693_v10 }
 0x412   : > { %v1672_v61 = vpop.f32.mrf.mxu3 }
 0x413   : > { %v1694_v63 = vmul.f32 %v2069_v6, %v1672_v61 }
 0x415   : > { %1710 = vst [vmem:[%s3100_s12 + $0x68] sm:$0xff] %v1694_v63 }
 0x41a   : > { %v1675_v11 = vpop.f32.mrf.mxu3 }
 0x41b   : > { %v1695_v13 = vmul.f32 %v2070_v12, %v1675_v11 }
 0x41d   : > { %1711 = vst [vmem:[%s3100_s12 + $0x70] sm:$0xff] %v1695_v13 }
 0x420   : > { %v1633_v7 = vpop.f32.mrf.mxu1 }
 0x421   : > { %v1681_v8 = vmul.f32 %v2071_v15, %v1633_v7 }
 0x422   : > { %v1678_v16 = vpop.f32.mrf.mxu3 }
 0x423   : > { %1697 = vst [vmem:[%s3100_s12] sm:$0xff] %v1681_v8  ;;  %v1696_v14 = vmul.f32 %v2072_v18, %v1678_v16 }
 0x425   : > { %1712 = vst [vmem:[%s3100_s12 + $0x78] sm:$0xff] %v1696_v14 }
 0x426 PF: > { %s17_s24 = sadd.s32 1, %s2079_s24  }
 0x427   : > { %p14_p4 = scmp.ge.s32.totalorder %s17_s24, 4  }
 0x429   :  { %16 = sbr.rel (!%p14_p4) target bundleno = 1 (0x1), region = 80 }

</bundles_post_ra>
